<compile_context>
chip_gen: v6e
topology: v6e:2x2x1
jax: 0.10.0
libtpu: 0.0.40
codegen_flags: <defaults>
</compile_context>

<pallas_src>
import functools
import numpy as np
import jax
import jax.numpy as jnp
from jax.experimental import pallas as pl
from jax.experimental.pallas import tpu as pltpu


def _lstm_cell(gates, c_prev):
    """gates: (Bp, 4H) f32 pre-activations [i|f|g|o]; c_prev: (Bp, H) f32."""
    H = gates.shape[-1] // 4
    # Full-width transcendentals (whole vreg), slice the quarters afterwards.
    sg = jax.nn.sigmoid(gates)
    tg = jnp.tanh(gates)
    i = sg[:, 0 * H:1 * H]
    f = sg[:, 1 * H:2 * H]
    g = tg[:, 2 * H:3 * H]
    o = sg[:, 3 * H:4 * H]
    c = f * c_prev + i * g
    h = o * jnp.tanh(c)
    return h, c


# -----------------------------------------------------------------------------
# Fused bidirectional LSTM layer (single kernel invocation, no grid).
#   x_ref   : (T*Bp, E)   bf16  time-major flattened input
#   wih_ref : (E, 8H)     bf16  [W_ih_fwd | W_ih_bwd] stacked on the out axis
#   whh_ref : (2, H, 4H)  bf16  per-direction recurrent weights
#   b_ref   : (1, 8H)     f32   [b_fwd | b_bwd], each = b_ih + b_hh
#   h0_ref, c0_ref : (2, Bp, H) f32
#   out_ref : (T, Bp, 2H) f32   next-layer layout [h_fwd | h_bwd]
#   hT_ref, cT_ref : (2, Bp, H) f32
#   gx_ref  : VMEM scratch (T*Bp, 8H) f32 (hoisted input projection)
# -----------------------------------------------------------------------------
def bilstm_fused_kernel(x_ref, wih_ref, whh_ref, b_ref, h0_ref, c0_ref,
                        out_ref, hT_ref, cT_ref, gx_ref):
    T, Bp, H2 = out_ref.shape
    H = H2 // 2
    G = 4 * H

    # Hoisted input projection for BOTH directions in one bf16 MXU matmul.
    gx_ref[...] = (jnp.dot(x_ref[...], wih_ref[...],
                           preferred_element_type=jnp.float32)
                   + b_ref[...])

    whh_f = whh_ref[0]                     # (H, 4H) bf16, loop-invariant
    whh_b = whh_ref[1]

    def step(t, carry):
        h_f, c_f, h_b, c_b = carry
        tb = T - 1 - t                     # backward time index (pure index math)
        row_f = pl.multiple_of(t * Bp, Bp)
        row_b = pl.multiple_of(tb * Bp, Bp)

        # Two independent recurrent chains in one loop body -> LLO interleaves
        # their MXU/EUP latencies on single-TC chips.
        gates_f = gx_ref[pl.ds(row_f, Bp), 0:G] + jnp.dot(
            h_f.astype(jnp.bfloat16), whh_f, preferred_element_type=jnp.float32)
        gates_b = gx_ref[pl.ds(row_b, Bp), G:2 * G] + jnp.dot(
            h_b.astype(jnp.bfloat16), whh_b, preferred_element_type=jnp.float32)

        h_f, c_f = _lstm_cell(gates_f, c_f)
        h_b, c_b = _lstm_cell(gates_b, c_b)

        # Write directly in next-layer layout (T, Bp, 2H).
        # NOTE: with H=32 these are sub-128-lane masked stores; production sizes
        # should use H a multiple of 128 for unmasked lane-dense stores.
        out_ref[t, :, 0:H] = h_f
        out_ref[tb, :, H:2 * H] = h_b
        return h_f, c_f, h_b, c_b

    carry0 = (h0_ref[0], c0_ref[0], h0_ref[1], c0_ref[1])
    h_f, c_f, h_b, c_b = jax.lax.fori_loop(
        0, T, step, carry0, unroll=True if T <= 16 else 8)

    hT_ref[0] = h_f
    hT_ref[1] = h_b
    cT_ref[0] = c_f
    cT_ref[1] = c_b


def bilstm_layer_pallas(x_flat, wih, whh, b, h0, c0, T):
    """x_flat: (T*Bp, E) f32; wih: (2, E, 4H); whh: (2, H, 4H); b: (2, 1, 4H);
    h0, c0: (2, Bp, H).  Returns out (T, Bp, 2H), hT (2, Bp, H), cT (2, Bp, H)."""
    TB, E = x_flat.shape
    Bp = TB // T
    H = h0.shape[-1]
    G2 = 8 * H

    # Pack once per call (in production this packing would be hoisted to init):
    # bf16 MXU operands, W_ih / bias stacked over directions along the out axis.
    x_bf = x_flat.astype(jnp.bfloat16)
    wih_packed = jnp.concatenate([wih[0], wih[1]], axis=-1).astype(jnp.bfloat16)
    whh_bf = whh.astype(jnp.bfloat16)
    b_packed = jnp.concatenate([b[0], b[1]], axis=-1)      # stays f32

    out_shapes = (jax.ShapeDtypeStruct((T, Bp, 2 * H), jnp.float32),
                  jax.ShapeDtypeStruct((2, Bp, H), jnp.float32),
                  jax.ShapeDtypeStruct((2, Bp, H), jnp.float32))

    flops = (2 * TB * E * G2            # input projection (both dirs)
             + 2 * TB * H * G2          # recurrent matmuls (both dirs, all steps)
             + 16 * TB * H)             # gate combine / cell update
    transcendentals = 18 * TB * H       # sigmoid(4H)+tanh(4H)+tanh(H) per dir/step
    bytes_accessed = (2 * TB * E + 2 * E * G2 + 2 * 2 * H * 4 * H + 4 * G2
                      + 4 * 4 * Bp * H            # h0, c0
                      + 4 * TB * 2 * H            # out
                      + 4 * 4 * Bp * H)           # hT, cT
    cost = pl.CostEstimate(flops=flops, transcendentals=transcendentals,
                           bytes_accessed=bytes_accessed)

    vmem_spec = pl.BlockSpec(memory_space=pltpu.MemorySpace.VMEM)
    return pl.pallas_call(
        bilstm_fused_kernel,
        out_shape=out_shapes,
        in_specs=[vmem_spec] * 6,
        out_specs=(vmem_spec, vmem_spec, vmem_spec),
        scratch_shapes=[pltpu.VMEM((TB, G2), jnp.float32)],
        compiler_params=pltpu.CompilerParams(
            vmem_limit_bytes=48 * 1024 * 1024),
        cost_estimate=cost,
    )(x_bf, wih_packed, whh_bf, b_packed, h0, c0)


# -----------------------------------------------------------------------------
# Pure-JAX f32 reference with the same signature (correctness check only).
# -----------------------------------------------------------------------------
def bilstm_layer_ref(x_flat, wih, whh, b, h0, c0, T):
    Bp = x_flat.shape[0] // T
    H = h0.shape[-1]
    x = x_flat.reshape(T, Bp, -1)
    outs, hTs, cTs = [], [], []
    for d in range(2):
        gx = jnp.einsum('tbe,eg->tbg', x, wih[d]) + b[d]

        def step(carry, g_t, d=d):
            h, c = carry
            gates = g_t + h @ whh[d]
            i = jax.nn.sigmoid(gates[:, 0 * H:1 * H])
            f = jax.nn.sigmoid(gates[:, 1 * H:2 * H])
            g = jnp.tanh(gates[:, 2 * H:3 * H])
            o = jax.nn.sigmoid(gates[:, 3 * H:4 * H])
            c = f * c + i * g
            h = o * jnp.tanh(c)
            return (h, c), h

        gxd = gx if d == 0 else gx[::-1]
        (hT, cT), out = jax.lax.scan(step, (h0[d], c0[d]), gxd)
        if d == 1:
            out = out[::-1]
        outs.append(out)
        hTs.append(hT)
        cTs.append(cT)
    return jnp.concatenate(outs, axis=-1), jnp.stack(hTs), jnp.stack(cTs)


# -----------------------------------------------------------------------------
# EncoderRNN forward: embedding -> (dropout) -> bidirectional multi-layer LSTM.
# -----------------------------------------------------------------------------
def encoder_rnn_forward(input_ids, hidden, embedding, lstm_weights,
                        num_layers, layer_fn):
    h0_all, c0_all = hidden                       # (2L, B, H) each
    B, T = input_ids.shape

    emb = jnp.take(embedding, input_ids, axis=0)  # (B, T, E)
    # TODO(synk): nn.Dropout is stochastic only in train mode; inference => identity.
    x = jnp.transpose(emb, (1, 0, 2))             # time-major (T, B, E)

    # Pad batch to a sublane multiple (>=8).  Padded rows never mix with real
    # rows (all ops are row-independent) and are sliced away at the end.
    Bp = max(8, ((B + 7) // 8) * 8)
    pad = Bp - B
    x = jnp.pad(x, ((0, 0), (0, pad), (0, 0)))
    h0p = jnp.pad(h0_all, ((0, 0), (0, pad), (0, 0)))
    c0p = jnp.pad(c0_all, ((0, 0), (0, pad), (0, 0)))

    h_finals, c_finals = [], []
    for l in range(num_layers):
        wih, whh, b = lstm_weights[l]             # (2,in,4H), (2,H,4H), (2,1,4H)
        x_flat = x.reshape(T * Bp, x.shape[-1])   # free reshape (contiguous)
        out, hT, cT = layer_fn(x_flat, wih, whh, b,
                               h0p[2 * l:2 * l + 2], c0p[2 * l:2 * l + 2], T=T)
        x = out                                    # (T, Bp, 2H) already next-layer layout
        h_finals.append(hT)
        c_finals.append(cT)
        # TODO(synk): inter-layer LSTM dropout (train mode only) omitted.

    output = jnp.transpose(x[:, :B], (1, 0, 2))     # batch_first (B, T, 2H)
    h_n = jnp.concatenate(h_finals, axis=0)[:, :B]  # (2L, B, H)
    c_n = jnp.concatenate(c_finals, axis=0)[:, :B]
    return output, (h_n, c_n)


# -----------------------------------------------------------------------------
# Deterministic parameter init (PyTorch-like uniform(-1/sqrt(H), 1/sqrt(H))),
# with per-layer direction-stacked, pre-transposed f32 weights.
# -----------------------------------------------------------------------------
def init_params(key, vocab, E, H, L):
    keys = jax.random.split(key, 1 + 4 * 2 * L)
    embedding = jax.random.normal(keys[0], (vocab, E), jnp.float32)
    k = 1.0 / np.sqrt(H)
    lstm_weights = []
    ki = 1
    for l in range(L):
        in_dim = E if l == 0 else 2 * H
        wihs, whhs, bs = [], [], []
        for _d in range(2):
            w_ih = jax.random.uniform(keys[ki + 0], (4 * H, in_dim), jnp.float32, -k, k)
            w_hh = jax.random.uniform(keys[ki + 1], (4 * H, H), jnp.float32, -k, k)
            b_ih = jax.random.uniform(keys[ki + 2], (4 * H,), jnp.float32, -k, k)
            b_hh = jax.random.uniform(keys[ki + 3], (4 * H,), jnp.float32, -k, k)
            ki += 4
            wihs.append(w_ih.T)                        # (in_dim, 4H)
            whhs.append(w_hh.T)                        # (H, 4H)
            bs.append((b_ih + b_hh).reshape(1, 4 * H))
        lstm_weights.append((jnp.stack(wihs), jnp.stack(whhs), jnp.stack(bs)))
    return embedding, lstm_weights


if __name__ == "__main__":
    # Small shapes consistent with the module.
    VOCAB, E, H, L = 50, 32, 32, 2
    B, T = 4, 8

    key = jax.random.PRNGKey(0)
    k_param, k_ids = jax.random.split(key)
    embedding, lstm_weights = init_params(k_param, VOCAB, E, H, L)

    input_ids = jax.random.randint(k_ids, (B, T), 0, VOCAB)      # (B, T) ids
    hidden = (jnp.zeros((2 * L, B, H), jnp.float32),             # init_hidden()
              jnp.zeros((2 * L, B, H), jnp.float32))

    fwd = functools.partial(encoder_rnn_forward, embedding=embedding,
                            lstm_weights=lstm_weights, num_layers=L)

    out_p, (hn_p, cn_p) = fwd(input_ids, hidden, layer_fn=bilstm_layer_pallas)
    jax.block_until_ready(out_p)

    out_r, (hn_r, cn_r) = fwd(input_ids, hidden, layer_fn=bilstm_layer_ref)

    assert out_p.shape == (B, T, 2 * H)
    assert hn_p.shape == (2 * L, B, H) and cn_p.shape == (2 * L, B, H)
    # Tolerances loosened vs the all-f32 version: kernel uses bf16 MXU operands
    # (weights + x/h at the dot sites); gate math and accumulation stay f32.
    np.testing.assert_allclose(np.asarray(out_p), np.asarray(out_r), atol=3e-2, rtol=3e-2)
    np.testing.assert_allclose(np.asarray(hn_p), np.asarray(hn_r), atol=3e-2, rtol=3e-2)
    np.testing.assert_allclose(np.asarray(cn_p), np.asarray(cn_r), atol=3e-2, rtol=3e-2)

    print("KERNEL_OK")
</pallas_src>

<mosaic_0001>
module attributes {stable_mosaic.version = 11 : i64} {
  func.func @bilstm_fused_kernel(%arg0: memref<64x32xbf16, #tpu.memory_space<vmem>>, %arg1: memref<32x256xbf16, #tpu.memory_space<vmem>>, %arg2: memref<2x32x128xbf16, #tpu.memory_space<vmem>>, %arg3: memref<1x256xf32, #tpu.memory_space<vmem>>, %arg4: memref<2x8x32xf32, #tpu.memory_space<vmem>>, %arg5: memref<2x8x32xf32, #tpu.memory_space<vmem>>, %arg6: memref<8x8x64xf32, #tpu.memory_space<vmem>>, %arg7: memref<2x8x32xf32, #tpu.memory_space<vmem>>, %arg8: memref<2x8x32xf32, #tpu.memory_space<vmem>>, %arg9: memref<64x256xf32, #tpu.memory_space<vmem>>) attributes {dimension_semantics = [], scalar_prefetch = 0 : i64, scratch_operands = 1 : i64, tpu.core_type = #tpu.core_type<tc>} {
    %c0 = arith.constant 0 : index
    %c0_0 = arith.constant 0 : index
    %0 = vector.load %arg0[%c0, %c0_0] : memref<64x32xbf16, #tpu.memory_space<vmem>>, vector<64x32xbf16>
    %c0_1 = arith.constant 0 : index
    %c0_2 = arith.constant 0 : index
    %1 = vector.load %arg1[%c0_1, %c0_2] : memref<32x256xbf16, #tpu.memory_space<vmem>>, vector<32x256xbf16>
    %cst = arith.constant dense<0.000000e+00> : vector<64x256xf32>
    %2 = tpu.matmul %0, %1, %cst {dimension_numbers = #tpu.dot_dimension_numbers<[1], [0], [0], [1], [0, 0, 1, 1], [], []>} : vector<64x32xbf16>, vector<32x256xbf16>, vector<64x256xf32> -> vector<64x256xf32>
    %c0_3 = arith.constant 0 : index
    %c0_4 = arith.constant 0 : index
    %3 = vector.load %arg3[%c0_3, %c0_4] : memref<1x256xf32, #tpu.memory_space<vmem>>, vector<1x256xf32>
    %4 = vector.broadcast %3 : vector<1x256xf32> to vector<64x256xf32>
    %5 = arith.addf %2, %4 : vector<64x256xf32>
    %c0_5 = arith.constant 0 : index
    %c0_6 = arith.constant 0 : index
    %6 = vector.load %arg9[%c0_5, %c0_6] : memref<64x256xf32, #tpu.memory_space<vmem>>, vector<64x256xf32>
    tpu.vector_store %arg9[%c0_5, %c0_6], %5 {strides = array<i32>} : memref<64x256xf32, #tpu.memory_space<vmem>>, vector<64x256xf32>,
    %c0_7 = arith.constant 0 : index
    %c0_8 = arith.constant 0 : index
    %c0_9 = arith.constant 0 : index
    %7 = vector.load %arg2[%c0_7, %c0_8, %c0_9] : memref<2x32x128xbf16, #tpu.memory_space<vmem>>, vector<1x32x128xbf16>
    %8 = vector.shape_cast %7 : vector<1x32x128xbf16> to vector<32x128xbf16>
    %c1 = arith.constant 1 : index
    %c0_10 = arith.constant 0 : index
    %c0_11 = arith.constant 0 : index
    %9 = vector.load %arg2[%c1, %c0_10, %c0_11] : memref<2x32x128xbf16, #tpu.memory_space<vmem>>, vector<1x32x128xbf16>
    %10 = vector.shape_cast %9 : vector<1x32x128xbf16> to vector<32x128xbf16>
    %c0_12 = arith.constant 0 : index
    %c0_13 = arith.constant 0 : index
    %c0_14 = arith.constant 0 : index
    %11 = vector.load %arg4[%c0_12, %c0_13, %c0_14] : memref<2x8x32xf32, #tpu.memory_space<vmem>>, vector<1x8x32xf32>
    %12 = vector.shape_cast %11 : vector<1x8x32xf32> to vector<8x32xf32>
    %c0_15 = arith.constant 0 : index
    %c0_16 = arith.constant 0 : index
    %c0_17 = arith.constant 0 : index
    %13 = vector.load %arg5[%c0_15, %c0_16, %c0_17] : memref<2x8x32xf32, #tpu.memory_space<vmem>>, vector<1x8x32xf32>
    %14 = vector.shape_cast %13 : vector<1x8x32xf32> to vector<8x32xf32>
    %c1_18 = arith.constant 1 : index
    %c0_19 = arith.constant 0 : index
    %c0_20 = arith.constant 0 : index
    %15 = vector.load %arg4[%c1_18, %c0_19, %c0_20] : memref<2x8x32xf32, #tpu.memory_space<vmem>>, vector<1x8x32xf32>
    %16 = vector.shape_cast %15 : vector<1x8x32xf32> to vector<8x32xf32>
    %c1_21 = arith.constant 1 : index
    %c0_22 = arith.constant 0 : index
    %c0_23 = arith.constant 0 : index
    %17 = vector.load %arg5[%c1_21, %c0_22, %c0_23] : memref<2x8x32xf32, #tpu.memory_space<vmem>>, vector<1x8x32xf32>
    %18 = vector.shape_cast %17 : vector<1x8x32xf32> to vector<8x32xf32>
    %c0_i32 = arith.constant 0 : i32
    %c7_i32 = arith.constant 7 : i32
    %19 = arith.subi %c7_i32, %c0_i32 : i32
    %c8_i32 = arith.constant 8 : i32
    %20 = arith.muli %c0_i32, %c8_i32 : i32
    %21 = tpu.assume_multiple %20, 8 : i32
    %c8_i32_24 = arith.constant 8 : i32
    %22 = arith.muli %19, %c8_i32_24 : i32
    %23 = tpu.assume_multiple %22, 8 : i32
    %24 = arith.index_cast %21 : i32 to index
    %c0_25 = arith.constant 0 : index
    %25 = vector.load %arg9[%24, %c0_25] : memref<64x256xf32, #tpu.memory_space<vmem>>, vector<8x128xf32>
    %26 = arith.truncf %12 : vector<8x32xf32> to vector<8x32xbf16>
    %cst_26 = arith.constant dense<0.000000e+00> : vector<8x128xf32>
    %27 = tpu.matmul %26, %8, %cst_26 {dimension_numbers = #tpu.dot_dimension_numbers<[1], [0], [0], [1], [0, 0, 1, 1], [], []>} : vector<8x32xbf16>, vector<32x128xbf16>, vector<8x128xf32> -> vector<8x128xf32>
    %28 = arith.addf %25, %27 : vector<8x128xf32>
    %29 = arith.index_cast %23 : i32 to index
    %c128 = arith.constant 128 : index
    %30 = vector.load %arg9[%29, %c128] : memref<64x256xf32, #tpu.memory_space<vmem>>, vector<8x128xf32>
    %31 = arith.truncf %16 : vector<8x32xf32> to vector<8x32xbf16>
    %cst_27 = arith.constant dense<0.000000e+00> : vector<8x128xf32>
    %32 = tpu.matmul %31, %10, %cst_27 {dimension_numbers = #tpu.dot_dimension_numbers<[1], [0], [0], [1], [0, 0, 1, 1], [], []>} : vector<8x32xbf16>, vector<32x128xbf16>, vector<8x128xf32> -> vector<8x128xf32>
    %33 = arith.addf %30, %32 : vector<8x128xf32>
    %34 = arith.negf %28 : vector<8x128xf32>
    %35 = math.exp %34 : vector<8x128xf32>
    %cst_28 = arith.constant 1.000000e+00 : f32
    %36 = vector.broadcast %cst_28 : f32 to vector<8x128xf32>
    %37 = arith.addf %36, %35 : vector<8x128xf32>
    %38 = arith.divf %36, %37 : vector<8x128xf32>
    %39 = math.tanh %28 : vector<8x128xf32>
    %40 = vector.extract_strided_slice %38 {offsets = [0, 0], sizes = [8, 32], strides = [1, 1]} : vector<8x128xf32> to vector<8x32xf32>
    %41 = vector.extract_strided_slice %38 {offsets = [0, 32], sizes = [8, 32], strides = [1, 1]} : vector<8x128xf32> to vector<8x32xf32>
    %42 = vector.extract_strided_slice %39 {offsets = [0, 64], sizes = [8, 32], strides = [1, 1]} : vector<8x128xf32> to vector<8x32xf32>
    %43 = vector.extract_strided_slice %38 {offsets = [0, 96], sizes = [8, 32], strides = [1, 1]} : vector<8x128xf32> to vector<8x32xf32>
    %44 = arith.mulf %41, %14 : vector<8x32xf32>
    %45 = arith.mulf %40, %42 : vector<8x32xf32>
    %46 = arith.addf %44, %45 : vector<8x32xf32>
    %47 = math.tanh %46 : vector<8x32xf32>
    %48 = arith.mulf %43, %47 : vector<8x32xf32>
    %49 = arith.negf %33 : vector<8x128xf32>
    %50 = math.exp %49 : vector<8x128xf32>
    %cst_29 = arith.constant 1.000000e+00 : f32
    %51 = vector.broadcast %cst_29 : f32 to vector<8x128xf32>
    %52 = arith.addf %51, %50 : vector<8x128xf32>
    %53 = arith.divf %51, %52 : vector<8x128xf32>
    %54 = math.tanh %33 : vector<8x128xf32>
    %55 = vector.extract_strided_slice %53 {offsets = [0, 0], sizes = [8, 32], strides = [1, 1]} : vector<8x128xf32> to vector<8x32xf32>
    %56 = vector.extract_strided_slice %53 {offsets = [0, 32], sizes = [8, 32], strides = [1, 1]} : vector<8x128xf32> to vector<8x32xf32>
    %57 = vector.extract_strided_slice %54 {offsets = [0, 64], sizes = [8, 32], strides = [1, 1]} : vector<8x128xf32> to vector<8x32xf32>
    %58 = vector.extract_strided_slice %53 {offsets = [0, 96], sizes = [8, 32], strides = [1, 1]} : vector<8x128xf32> to vector<8x32xf32>
    %59 = arith.mulf %56, %18 : vector<8x32xf32>
    %60 = arith.mulf %55, %57 : vector<8x32xf32>
    %61 = arith.addf %59, %60 : vector<8x32xf32>
    %62 = math.tanh %61 : vector<8x32xf32>
    %63 = arith.mulf %58, %62 : vector<8x32xf32>
    %64 = arith.index_cast %c0_i32 : i32 to index
    %c0_30 = arith.constant 0 : index
    %c0_31 = arith.constant 0 : index
    %65 = vector.load %arg6[%64, %c0_30, %c0_31] : memref<8x8x64xf32, #tpu.memory_space<vmem>>, vector<1x8x32xf32>
    %66 = vector.shape_cast %65 : vector<1x8x32xf32> to vector<8x32xf32>
    %67 = vector.shape_cast %48 : vector<8x32xf32> to vector<1x8x32xf32>
    tpu.vector_store %arg6[%64, %c0_30, %c0_31], %67 {strides = array<i32>} : memref<8x8x64xf32, #tpu.memory_space<vmem>>, vector<1x8x32xf32>,
    %68 = arith.index_cast %19 : i32 to index
    %c0_32 = arith.constant 0 : index
    %c32 = arith.constant 32 : index
    %69 = vector.load %arg6[%68, %c0_32, %c32] : memref<8x8x64xf32, #tpu.memory_space<vmem>>, vector<1x8x32xf32>
    %70 = vector.shape_cast %69 : vector<1x8x32xf32> to vector<8x32xf32>
    %71 = vector.shape_cast %63 : vector<8x32xf32> to vector<1x8x32xf32>
    tpu.vector_store %arg6[%68, %c0_32, %c32], %71 {strides = array<i32>} : memref<8x8x64xf32, #tpu.memory_space<vmem>>, vector<1x8x32xf32>,
    %c1_i32 = arith.constant 1 : i32
    %c7_i32_33 = arith.constant 7 : i32
    %72 = arith.subi %c7_i32_33, %c1_i32 : i32
    %c8_i32_34 = arith.constant 8 : i32
    %73 = arith.muli %c1_i32, %c8_i32_34 : i32
    %74 = tpu.assume_multiple %73, 8 : i32
    %c8_i32_35 = arith.constant 8 : i32
    %75 = arith.muli %72, %c8_i32_35 : i32
    %76 = tpu.assume_multiple %75, 8 : i32
    %77 = arith.index_cast %74 : i32 to index
    %c0_36 = arith.constant 0 : index
    %78 = vector.load %arg9[%77, %c0_36] : memref<64x256xf32, #tpu.memory_space<vmem>>, vector<8x128xf32>
    %79 = arith.truncf %48 : vector<8x32xf32> to vector<8x32xbf16>
    %cst_37 = arith.constant dense<0.000000e+00> : vector<8x128xf32>
    %80 = tpu.matmul %79, %8, %cst_37 {dimension_numbers = #tpu.dot_dimension_numbers<[1], [0], [0], [1], [0, 0, 1, 1], [], []>} : vector<8x32xbf16>, vector<32x128xbf16>, vector<8x128xf32> -> vector<8x128xf32>
    %81 = arith.addf %78, %80 : vector<8x128xf32>
    %82 = arith.index_cast %76 : i32 to index
    %c128_38 = arith.constant 128 : index
    %83 = vector.load %arg9[%82, %c128_38] : memref<64x256xf32, #tpu.memory_space<vmem>>, vector<8x128xf32>
    %84 = arith.truncf %63 : vector<8x32xf32> to vector<8x32xbf16>
    %cst_39 = arith.constant dense<0.000000e+00> : vector<8x128xf32>
    %85 = tpu.matmul %84, %10, %cst_39 {dimension_numbers = #tpu.dot_dimension_numbers<[1], [0], [0], [1], [0, 0, 1, 1], [], []>} : vector<8x32xbf16>, vector<32x128xbf16>, vector<8x128xf32> -> vector<8x128xf32>
    %86 = arith.addf %83, %85 : vector<8x128xf32>
    %87 = arith.negf %81 : vector<8x128xf32>
    %88 = math.exp %87 : vector<8x128xf32>
    %cst_40 = arith.constant 1.000000e+00 : f32
    %89 = vector.broadcast %cst_40 : f32 to vector<8x128xf32>
    %90 = arith.addf %89, %88 : vector<8x128xf32>
    %91 = arith.divf %89, %90 : vector<8x128xf32>
    %92 = math.tanh %81 : vector<8x128xf32>
    %93 = vector.extract_strided_slice %91 {offsets = [0, 0], sizes = [8, 32], strides = [1, 1]} : vector<8x128xf32> to vector<8x32xf32>
    %94 = vector.extract_strided_slice %91 {offsets = [0, 32], sizes = [8, 32], strides = [1, 1]} : vector<8x128xf32> to vector<8x32xf32>
    %95 = vector.extract_strided_slice %92 {offsets = [0, 64], sizes = [8, 32], strides = [1, 1]} : vector<8x128xf32> to vector<8x32xf32>
    %96 = vector.extract_strided_slice %91 {offsets = [0, 96], sizes = [8, 32], strides = [1, 1]} : vector<8x128xf32> to vector<8x32xf32>
    %97 = arith.mulf %94, %46 : vector<8x32xf32>
    %98 = arith.mulf %93, %95 : vector<8x32xf32>
    %99 = arith.addf %97, %98 : vector<8x32xf32>
    %100 = math.tanh %99 : vector<8x32xf32>
    %101 = arith.mulf %96, %100 : vector<8x32xf32>
    %102 = arith.negf %86 : vector<8x128xf32>
    %103 = math.exp %102 : vector<8x128xf32>
    %cst_41 = arith.constant 1.000000e+00 : f32
    %104 = vector.broadcast %cst_41 : f32 to vector<8x128xf32>
    %105 = arith.addf %104, %103 : vector<8x128xf32>
    %106 = arith.divf %104, %105 : vector<8x128xf32>
    %107 = math.tanh %86 : vector<8x128xf32>
    %108 = vector.extract_strided_slice %106 {offsets = [0, 0], sizes = [8, 32], strides = [1, 1]} : vector<8x128xf32> to vector<8x32xf32>
    %109 = vector.extract_strided_slice %106 {offsets = [0, 32], sizes = [8, 32], strides = [1, 1]} : vector<8x128xf32> to vector<8x32xf32>
    %110 = vector.extract_strided_slice %107 {offsets = [0, 64], sizes = [8, 32], strides = [1, 1]} : vector<8x128xf32> to vector<8x32xf32>
    %111 = vector.extract_strided_slice %106 {offsets = [0, 96], sizes = [8, 32], strides = [1, 1]} : vector<8x128xf32> to vector<8x32xf32>
    %112 = arith.mulf %109, %61 : vector<8x32xf32>
    %113 = arith.mulf %108, %110 : vector<8x32xf32>
    %114 = arith.addf %112, %113 : vector<8x32xf32>
    %115 = math.tanh %114 : vector<8x32xf32>
    %116 = arith.mulf %111, %115 : vector<8x32xf32>
    %117 = arith.index_cast %c1_i32 : i32 to index
    %c0_42 = arith.constant 0 : index
    %c0_43 = arith.constant 0 : index
    %118 = vector.load %arg6[%117, %c0_42, %c0_43] : memref<8x8x64xf32, #tpu.memory_space<vmem>>, vector<1x8x32xf32>
    %119 = vector.shape_cast %118 : vector<1x8x32xf32> to vector<8x32xf32>
    %120 = vector.shape_cast %101 : vector<8x32xf32> to vector<1x8x32xf32>
    tpu.vector_store %arg6[%117, %c0_42, %c0_43], %120 {strides = array<i32>} : memref<8x8x64xf32, #tpu.memory_space<vmem>>, vector<1x8x32xf32>,
    %121 = arith.index_cast %72 : i32 to index
    %c0_44 = arith.constant 0 : index
    %c32_45 = arith.constant 32 : index
    %122 = vector.load %arg6[%121, %c0_44, %c32_45] : memref<8x8x64xf32, #tpu.memory_space<vmem>>, vector<1x8x32xf32>
    %123 = vector.shape_cast %122 : vector<1x8x32xf32> to vector<8x32xf32>
    %124 = vector.shape_cast %116 : vector<8x32xf32> to vector<1x8x32xf32>
    tpu.vector_store %arg6[%121, %c0_44, %c32_45], %124 {strides = array<i32>} : memref<8x8x64xf32, #tpu.memory_space<vmem>>, vector<1x8x32xf32>,
    %c2_i32 = arith.constant 2 : i32
    %c7_i32_46 = arith.constant 7 : i32
    %125 = arith.subi %c7_i32_46, %c2_i32 : i32
    %c8_i32_47 = arith.constant 8 : i32
    %126 = arith.muli %c2_i32, %c8_i32_47 : i32
    %127 = tpu.assume_multiple %126, 8 : i32
    %c8_i32_48 = arith.constant 8 : i32
    %128 = arith.muli %125, %c8_i32_48 : i32
    %129 = tpu.assume_multiple %128, 8 : i32
    %130 = arith.index_cast %127 : i32 to index
    %c0_49 = arith.constant 0 : index
    %131 = vector.load %arg9[%130, %c0_49] : memref<64x256xf32, #tpu.memory_space<vmem>>, vector<8x128xf32>
    %132 = arith.truncf %101 : vector<8x32xf32> to vector<8x32xbf16>
    %cst_50 = arith.constant dense<0.000000e+00> : vector<8x128xf32>
    %133 = tpu.matmul %132, %8, %cst_50 {dimension_numbers = #tpu.dot_dimension_numbers<[1], [0], [0], [1], [0, 0, 1, 1], [], []>} : vector<8x32xbf16>, vector<32x128xbf16>, vector<8x128xf32> -> vector<8x128xf32>
    %134 = arith.addf %131, %133 : vector<8x128xf32>
    %135 = arith.index_cast %129 : i32 to index
    %c128_51 = arith.constant 128 : index
    %136 = vector.load %arg9[%135, %c128_51] : memref<64x256xf32, #tpu.memory_space<vmem>>, vector<8x128xf32>
    %137 = arith.truncf %116 : vector<8x32xf32> to vector<8x32xbf16>
    %cst_52 = arith.constant dense<0.000000e+00> : vector<8x128xf32>
    %138 = tpu.matmul %137, %10, %cst_52 {dimension_numbers = #tpu.dot_dimension_numbers<[1], [0], [0], [1], [0, 0, 1, 1], [], []>} : vector<8x32xbf16>, vector<32x128xbf16>, vector<8x128xf32> -> vector<8x128xf32>
    %139 = arith.addf %136, %138 : vector<8x128xf32>
    %140 = arith.negf %134 : vector<8x128xf32>
    %141 = math.exp %140 : vector<8x128xf32>
    %cst_53 = arith.constant 1.000000e+00 : f32
    %142 = vector.broadcast %cst_53 : f32 to vector<8x128xf32>
    %143 = arith.addf %142, %141 : vector<8x128xf32>
    %144 = arith.divf %142, %143 : vector<8x128xf32>
    %145 = math.tanh %134 : vector<8x128xf32>
    %146 = vector.extract_strided_slice %144 {offsets = [0, 0], sizes = [8, 32], strides = [1, 1]} : vector<8x128xf32> to vector<8x32xf32>
    %147 = vector.extract_strided_slice %144 {offsets = [0, 32], sizes = [8, 32], strides = [1, 1]} : vector<8x128xf32> to vector<8x32xf32>
    %148 = vector.extract_strided_slice %145 {offsets = [0, 64], sizes = [8, 32], strides = [1, 1]} : vector<8x128xf32> to vector<8x32xf32>
    %149 = vector.extract_strided_slice %144 {offsets = [0, 96], sizes = [8, 32], strides = [1, 1]} : vector<8x128xf32> to vector<8x32xf32>
    %150 = arith.mulf %147, %99 : vector<8x32xf32>
    %151 = arith.mulf %146, %148 : vector<8x32xf32>
    %152 = arith.addf %150, %151 : vector<8x32xf32>
    %153 = math.tanh %152 : vector<8x32xf32>
    %154 = arith.mulf %149, %153 : vector<8x32xf32>
    %155 = arith.negf %139 : vector<8x128xf32>
    %156 = math.exp %155 : vector<8x128xf32>
    %cst_54 = arith.constant 1.000000e+00 : f32
    %157 = vector.broadcast %cst_54 : f32 to vector<8x128xf32>
    %158 = arith.addf %157, %156 : vector<8x128xf32>
    %159 = arith.divf %157, %158 : vector<8x128xf32>
    %160 = math.tanh %139 : vector<8x128xf32>
    %161 = vector.extract_strided_slice %159 {offsets = [0, 0], sizes = [8, 32], strides = [1, 1]} : vector<8x128xf32> to vector<8x32xf32>
    %162 = vector.extract_strided_slice %159 {offsets = [0, 32], sizes = [8, 32], strides = [1, 1]} : vector<8x128xf32> to vector<8x32xf32>
    %163 = vector.extract_strided_slice %160 {offsets = [0, 64], sizes = [8, 32], strides = [1, 1]} : vector<8x128xf32> to vector<8x32xf32>
    %164 = vector.extract_strided_slice %159 {offsets = [0, 96], sizes = [8, 32], strides = [1, 1]} : vector<8x128xf32> to vector<8x32xf32>
    %165 = arith.mulf %162, %114 : vector<8x32xf32>
    %166 = arith.mulf %161, %163 : vector<8x32xf32>
    %167 = arith.addf %165, %166 : vector<8x32xf32>
    %168 = math.tanh %167 : vector<8x32xf32>
    %169 = arith.mulf %164, %168 : vector<8x32xf32>
    %170 = arith.index_cast %c2_i32 : i32 to index
    %c0_55 = arith.constant 0 : index
    %c0_56 = arith.constant 0 : index
    %171 = vector.load %arg6[%170, %c0_55, %c0_56] : memref<8x8x64xf32, #tpu.memory_space<vmem>>, vector<1x8x32xf32>
    %172 = vector.shape_cast %171 : vector<1x8x32xf32> to vector<8x32xf32>
    %173 = vector.shape_cast %154 : vector<8x32xf32> to vector<1x8x32xf32>
    tpu.vector_store %arg6[%170, %c0_55, %c0_56], %173 {strides = array<i32>} : memref<8x8x64xf32, #tpu.memory_space<vmem>>, vector<1x8x32xf32>,
    %174 = arith.index_cast %125 : i32 to index
    %c0_57 = arith.constant 0 : index
    %c32_58 = arith.constant 32 : index
    %175 = vector.load %arg6[%174, %c0_57, %c32_58] : memref<8x8x64xf32, #tpu.memory_space<vmem>>, vector<1x8x32xf32>
    %176 = vector.shape_cast %175 : vector<1x8x32xf32> to vector<8x32xf32>
    %177 = vector.shape_cast %169 : vector<8x32xf32> to vector<1x8x32xf32>
    tpu.vector_store %arg6[%174, %c0_57, %c32_58], %177 {strides = array<i32>} : memref<8x8x64xf32, #tpu.memory_space<vmem>>, vector<1x8x32xf32>,
    %c3_i32 = arith.constant 3 : i32
    %c7_i32_59 = arith.constant 7 : i32
    %178 = arith.subi %c7_i32_59, %c3_i32 : i32
    %c8_i32_60 = arith.constant 8 : i32
    %179 = arith.muli %c3_i32, %c8_i32_60 : i32
    %180 = tpu.assume_multiple %179, 8 : i32
    %c8_i32_61 = arith.constant 8 : i32
    %181 = arith.muli %178, %c8_i32_61 : i32
    %182 = tpu.assume_multiple %181, 8 : i32
    %183 = arith.index_cast %180 : i32 to index
    %c0_62 = arith.constant 0 : index
    %184 = vector.load %arg9[%183, %c0_62] : memref<64x256xf32, #tpu.memory_space<vmem>>, vector<8x128xf32>
    %185 = arith.truncf %154 : vector<8x32xf32> to vector<8x32xbf16>
    %cst_63 = arith.constant dense<0.000000e+00> : vector<8x128xf32>
    %186 = tpu.matmul %185, %8, %cst_63 {dimension_numbers = #tpu.dot_dimension_numbers<[1], [0], [0], [1], [0, 0, 1, 1], [], []>} : vector<8x32xbf16>, vector<32x128xbf16>, vector<8x128xf32> -> vector<8x128xf32>
    %187 = arith.addf %184, %186 : vector<8x128xf32>
    %188 = arith.index_cast %182 : i32 to index
    %c128_64 = arith.constant 128 : index
    %189 = vector.load %arg9[%188, %c128_64] : memref<64x256xf32, #tpu.memory_space<vmem>>, vector<8x128xf32>
    %190 = arith.truncf %169 : vector<8x32xf32> to vector<8x32xbf16>
    %cst_65 = arith.constant dense<0.000000e+00> : vector<8x128xf32>
    %191 = tpu.matmul %190, %10, %cst_65 {dimension_numbers = #tpu.dot_dimension_numbers<[1], [0], [0], [1], [0, 0, 1, 1], [], []>} : vector<8x32xbf16>, vector<32x128xbf16>, vector<8x128xf32> -> vector<8x128xf32>
    %192 = arith.addf %189, %191 : vector<8x128xf32>
    %193 = arith.negf %187 : vector<8x128xf32>
    %194 = math.exp %193 : vector<8x128xf32>
    %cst_66 = arith.constant 1.000000e+00 : f32
    %195 = vector.broadcast %cst_66 : f32 to vector<8x128xf32>
    %196 = arith.addf %195, %194 : vector<8x128xf32>
    %197 = arith.divf %195, %196 : vector<8x128xf32>
    %198 = math.tanh %187 : vector<8x128xf32>
    %199 = vector.extract_strided_slice %197 {offsets = [0, 0], sizes = [8, 32], strides = [1, 1]} : vector<8x128xf32> to vector<8x32xf32>
    %200 = vector.extract_strided_slice %197 {offsets = [0, 32], sizes = [8, 32], strides = [1, 1]} : vector<8x128xf32> to vector<8x32xf32>
    %201 = vector.extract_strided_slice %198 {offsets = [0, 64], sizes = [8, 32], strides = [1, 1]} : vector<8x128xf32> to vector<8x32xf32>
    %202 = vector.extract_strided_slice %197 {offsets = [0, 96], sizes = [8, 32], strides = [1, 1]} : vector<8x128xf32> to vector<8x32xf32>
    %203 = arith.mulf %200, %152 : vector<8x32xf32>
    %204 = arith.mulf %199, %201 : vector<8x32xf32>
    %205 = arith.addf %203, %204 : vector<8x32xf32>
    %206 = math.tanh %205 : vector<8x32xf32>
    %207 = arith.mulf %202, %206 : vector<8x32xf32>
    %208 = arith.negf %192 : vector<8x128xf32>
    %209 = math.exp %208 : vector<8x128xf32>
    %cst_67 = arith.constant 1.000000e+00 : f32
    %210 = vector.broadcast %cst_67 : f32 to vector<8x128xf32>
    %211 = arith.addf %210, %209 : vector<8x128xf32>
    %212 = arith.divf %210, %211 : vector<8x128xf32>
    %213 = math.tanh %192 : vector<8x128xf32>
    %214 = vector.extract_strided_slice %212 {offsets = [0, 0], sizes = [8, 32], strides = [1, 1]} : vector<8x128xf32> to vector<8x32xf32>
    %215 = vector.extract_strided_slice %212 {offsets = [0, 32], sizes = [8, 32], strides = [1, 1]} : vector<8x128xf32> to vector<8x32xf32>
    %216 = vector.extract_strided_slice %213 {offsets = [0, 64], sizes = [8, 32], strides = [1, 1]} : vector<8x128xf32> to vector<8x32xf32>
    %217 = vector.extract_strided_slice %212 {offsets = [0, 96], sizes = [8, 32], strides = [1, 1]} : vector<8x128xf32> to vector<8x32xf32>
    %218 = arith.mulf %215, %167 : vector<8x32xf32>
    %219 = arith.mulf %214, %216 : vector<8x32xf32>
    %220 = arith.addf %218, %219 : vector<8x32xf32>
    %221 = math.tanh %220 : vector<8x32xf32>
    %222 = arith.mulf %217, %221 : vector<8x32xf32>
    %223 = arith.index_cast %c3_i32 : i32 to index
    %c0_68 = arith.constant 0 : index
    %c0_69 = arith.constant 0 : index
    %224 = vector.load %arg6[%223, %c0_68, %c0_69] : memref<8x8x64xf32, #tpu.memory_space<vmem>>, vector<1x8x32xf32>
    %225 = vector.shape_cast %224 : vector<1x8x32xf32> to vector<8x32xf32>
    %226 = vector.shape_cast %207 : vector<8x32xf32> to vector<1x8x32xf32>
    tpu.vector_store %arg6[%223, %c0_68, %c0_69], %226 {strides = array<i32>} : memref<8x8x64xf32, #tpu.memory_space<vmem>>, vector<1x8x32xf32>,
    %227 = arith.index_cast %178 : i32 to index
    %c0_70 = arith.constant 0 : index
    %c32_71 = arith.constant 32 : index
    %228 = vector.load %arg6[%227, %c0_70, %c32_71] : memref<8x8x64xf32, #tpu.memory_space<vmem>>, vector<1x8x32xf32>
    %229 = vector.shape_cast %228 : vector<1x8x32xf32> to vector<8x32xf32>
    %230 = vector.shape_cast %222 : vector<8x32xf32> to vector<1x8x32xf32>
    tpu.vector_store %arg6[%227, %c0_70, %c32_71], %230 {strides = array<i32>} : memref<8x8x64xf32, #tpu.memory_space<vmem>>, vector<1x8x32xf32>,
    %c4_i32 = arith.constant 4 : i32
    %c7_i32_72 = arith.constant 7 : i32
    %231 = arith.subi %c7_i32_72, %c4_i32 : i32
    %c8_i32_73 = arith.constant 8 : i32
    %232 = arith.muli %c4_i32, %c8_i32_73 : i32
    %233 = tpu.assume_multiple %232, 8 : i32
    %c8_i32_74 = arith.constant 8 : i32
    %234 = arith.muli %231, %c8_i32_74 : i32
    %235 = tpu.assume_multiple %234, 8 : i32
    %236 = arith.index_cast %233 : i32 to index
    %c0_75 = arith.constant 0 : index
    %237 = vector.load %arg9[%236, %c0_75] : memref<64x256xf32, #tpu.memory_space<vmem>>, vector<8x128xf32>
    %238 = arith.truncf %207 : vector<8x32xf32> to vector<8x32xbf16>
    %cst_76 = arith.constant dense<0.000000e+00> : vector<8x128xf32>
    %239 = tpu.matmul %238, %8, %cst_76 {dimension_numbers = #tpu.dot_dimension_numbers<[1], [0], [0], [1], [0, 0, 1, 1], [], []>} : vector<8x32xbf16>, vector<32x128xbf16>, vector<8x128xf32> -> vector<8x128xf32>
    %240 = arith.addf %237, %239 : vector<8x128xf32>
    %241 = arith.index_cast %235 : i32 to index
    %c128_77 = arith.constant 128 : index
    %242 = vector.load %arg9[%241, %c128_77] : memref<64x256xf32, #tpu.memory_space<vmem>>, vector<8x128xf32>
    %243 = arith.truncf %222 : vector<8x32xf32> to vector<8x32xbf16>
    %cst_78 = arith.constant dense<0.000000e+00> : vector<8x128xf32>
    %244 = tpu.matmul %243, %10, %cst_78 {dimension_numbers = #tpu.dot_dimension_numbers<[1], [0], [0], [1], [0, 0, 1, 1], [], []>} : vector<8x32xbf16>, vector<32x128xbf16>, vector<8x128xf32> -> vector<8x128xf32>
    %245 = arith.addf %242, %244 : vector<8x128xf32>
    %246 = arith.negf %240 : vector<8x128xf32>
    %247 = math.exp %246 : vector<8x128xf32>
    %cst_79 = arith.constant 1.000000e+00 : f32
    %248 = vector.broadcast %cst_79 : f32 to vector<8x128xf32>
    %249 = arith.addf %248, %247 : vector<8x128xf32>
    %250 = arith.divf %248, %249 : vector<8x128xf32>
    %251 = math.tanh %240 : vector<8x128xf32>
    %252 = vector.extract_strided_slice %250 {offsets = [0, 0], sizes = [8, 32], strides = [1, 1]} : vector<8x128xf32> to vector<8x32xf32>
    %253 = vector.extract_strided_slice %250 {offsets = [0, 32], sizes = [8, 32], strides = [1, 1]} : vector<8x128xf32> to vector<8x32xf32>
    %254 = vector.extract_strided_slice %251 {offsets = [0, 64], sizes = [8, 32], strides = [1, 1]} : vector<8x128xf32> to vector<8x32xf32>
    %255 = vector.extract_strided_slice %250 {offsets = [0, 96], sizes = [8, 32], strides = [1, 1]} : vector<8x128xf32> to vector<8x32xf32>
    %256 = arith.mulf %253, %205 : vector<8x32xf32>
    %257 = arith.mulf %252, %254 : vector<8x32xf32>
    %258 = arith.addf %256, %257 : vector<8x32xf32>
    %259 = math.tanh %258 : vector<8x32xf32>
    %260 = arith.mulf %255, %259 : vector<8x32xf32>
    %261 = arith.negf %245 : vector<8x128xf32>
    %262 = math.exp %261 : vector<8x128xf32>
    %cst_80 = arith.constant 1.000000e+00 : f32
    %263 = vector.broadcast %cst_80 : f32 to vector<8x128xf32>
    %264 = arith.addf %263, %262 : vector<8x128xf32>
    %265 = arith.divf %263, %264 : vector<8x128xf32>
    %266 = math.tanh %245 : vector<8x128xf32>
    %267 = vector.extract_strided_slice %265 {offsets = [0, 0], sizes = [8, 32], strides = [1, 1]} : vector<8x128xf32> to vector<8x32xf32>
    %268 = vector.extract_strided_slice %265 {offsets = [0, 32], sizes = [8, 32], strides = [1, 1]} : vector<8x128xf32> to vector<8x32xf32>
    %269 = vector.extract_strided_slice %266 {offsets = [0, 64], sizes = [8, 32], strides = [1, 1]} : vector<8x128xf32> to vector<8x32xf32>
    %270 = vector.extract_strided_slice %265 {offsets = [0, 96], sizes = [8, 32], strides = [1, 1]} : vector<8x128xf32> to vector<8x32xf32>
    %271 = arith.mulf %268, %220 : vector<8x32xf32>
    %272 = arith.mulf %267, %269 : vector<8x32xf32>
    %273 = arith.addf %271, %272 : vector<8x32xf32>
    %274 = math.tanh %273 : vector<8x32xf32>
    %275 = arith.mulf %270, %274 : vector<8x32xf32>
    %276 = arith.index_cast %c4_i32 : i32 to index
    %c0_81 = arith.constant 0 : index
    %c0_82 = arith.constant 0 : index
    %277 = vector.load %arg6[%276, %c0_81, %c0_82] : memref<8x8x64xf32, #tpu.memory_space<vmem>>, vector<1x8x32xf32>
    %278 = vector.shape_cast %277 : vector<1x8x32xf32> to vector<8x32xf32>
    %279 = vector.shape_cast %260 : vector<8x32xf32> to vector<1x8x32xf32>
    tpu.vector_store %arg6[%276, %c0_81, %c0_82], %279 {strides = array<i32>} : memref<8x8x64xf32, #tpu.memory_space<vmem>>, vector<1x8x32xf32>,
    %280 = arith.index_cast %231 : i32 to index
    %c0_83 = arith.constant 0 : index
    %c32_84 = arith.constant 32 : index
    %281 = vector.load %arg6[%280, %c0_83, %c32_84] : memref<8x8x64xf32, #tpu.memory_space<vmem>>, vector<1x8x32xf32>
    %282 = vector.shape_cast %281 : vector<1x8x32xf32> to vector<8x32xf32>
    %283 = vector.shape_cast %275 : vector<8x32xf32> to vector<1x8x32xf32>
    tpu.vector_store %arg6[%280, %c0_83, %c32_84], %283 {strides = array<i32>} : memref<8x8x64xf32, #tpu.memory_space<vmem>>, vector<1x8x32xf32>,
    %c5_i32 = arith.constant 5 : i32
    %c7_i32_85 = arith.constant 7 : i32
    %284 = arith.subi %c7_i32_85, %c5_i32 : i32
    %c8_i32_86 = arith.constant 8 : i32
    %285 = arith.muli %c5_i32, %c8_i32_86 : i32
    %286 = tpu.assume_multiple %285, 8 : i32
    %c8_i32_87 = arith.constant 8 : i32
    %287 = arith.muli %284, %c8_i32_87 : i32
    %288 = tpu.assume_multiple %287, 8 : i32
    %289 = arith.index_cast %286 : i32 to index
    %c0_88 = arith.constant 0 : index
    %290 = vector.load %arg9[%289, %c0_88] : memref<64x256xf32, #tpu.memory_space<vmem>>, vector<8x128xf32>
    %291 = arith.truncf %260 : vector<8x32xf32> to vector<8x32xbf16>
    %cst_89 = arith.constant dense<0.000000e+00> : vector<8x128xf32>
    %292 = tpu.matmul %291, %8, %cst_89 {dimension_numbers = #tpu.dot_dimension_numbers<[1], [0], [0], [1], [0, 0, 1, 1], [], []>} : vector<8x32xbf16>, vector<32x128xbf16>, vector<8x128xf32> -> vector<8x128xf32>
    %293 = arith.addf %290, %292 : vector<8x128xf32>
    %294 = arith.index_cast %288 : i32 to index
    %c128_90 = arith.constant 128 : index
    %295 = vector.load %arg9[%294, %c128_90] : memref<64x256xf32, #tpu.memory_space<vmem>>, vector<8x128xf32>
    %296 = arith.truncf %275 : vector<8x32xf32> to vector<8x32xbf16>
    %cst_91 = arith.constant dense<0.000000e+00> : vector<8x128xf32>
    %297 = tpu.matmul %296, %10, %cst_91 {dimension_numbers = #tpu.dot_dimension_numbers<[1], [0], [0], [1], [0, 0, 1, 1], [], []>} : vector<8x32xbf16>, vector<32x128xbf16>, vector<8x128xf32> -> vector<8x128xf32>
    %298 = arith.addf %295, %297 : vector<8x128xf32>
    %299 = arith.negf %293 : vector<8x128xf32>
    %300 = math.exp %299 : vector<8x128xf32>
    %cst_92 = arith.constant 1.000000e+00 : f32
    %301 = vector.broadcast %cst_92 : f32 to vector<8x128xf32>
    %302 = arith.addf %301, %300 : vector<8x128xf32>
    %303 = arith.divf %301, %302 : vector<8x128xf32>
    %304 = math.tanh %293 : vector<8x128xf32>
    %305 = vector.extract_strided_slice %303 {offsets = [0, 0], sizes = [8, 32], strides = [1, 1]} : vector<8x128xf32> to vector<8x32xf32>
    %306 = vector.extract_strided_slice %303 {offsets = [0, 32], sizes = [8, 32], strides = [1, 1]} : vector<8x128xf32> to vector<8x32xf32>
    %307 = vector.extract_strided_slice %304 {offsets = [0, 64], sizes = [8, 32], strides = [1, 1]} : vector<8x128xf32> to vector<8x32xf32>
    %308 = vector.extract_strided_slice %303 {offsets = [0, 96], sizes = [8, 32], strides = [1, 1]} : vector<8x128xf32> to vector<8x32xf32>
    %309 = arith.mulf %306, %258 : vector<8x32xf32>
    %310 = arith.mulf %305, %307 : vector<8x32xf32>
    %311 = arith.addf %309, %310 : vector<8x32xf32>
    %312 = math.tanh %311 : vector<8x32xf32>
    %313 = arith.mulf %308, %312 : vector<8x32xf32>
    %314 = arith.negf %298 : vector<8x128xf32>
    %315 = math.exp %314 : vector<8x128xf32>
    %cst_93 = arith.constant 1.000000e+00 : f32
    %316 = vector.broadcast %cst_93 : f32 to vector<8x128xf32>
    %317 = arith.addf %316, %315 : vector<8x128xf32>
    %318 = arith.divf %316, %317 : vector<8x128xf32>
    %319 = math.tanh %298 : vector<8x128xf32>
    %320 = vector.extract_strided_slice %318 {offsets = [0, 0], sizes = [8, 32], strides = [1, 1]} : vector<8x128xf32> to vector<8x32xf32>
    %321 = vector.extract_strided_slice %318 {offsets = [0, 32], sizes = [8, 32], strides = [1, 1]} : vector<8x128xf32> to vector<8x32xf32>
    %322 = vector.extract_strided_slice %319 {offsets = [0, 64], sizes = [8, 32], strides = [1, 1]} : vector<8x128xf32> to vector<8x32xf32>
    %323 = vector.extract_strided_slice %318 {offsets = [0, 96], sizes = [8, 32], strides = [1, 1]} : vector<8x128xf32> to vector<8x32xf32>
    %324 = arith.mulf %321, %273 : vector<8x32xf32>
    %325 = arith.mulf %320, %322 : vector<8x32xf32>
    %326 = arith.addf %324, %325 : vector<8x32xf32>
    %327 = math.tanh %326 : vector<8x32xf32>
    %328 = arith.mulf %323, %327 : vector<8x32xf32>
    %329 = arith.index_cast %c5_i32 : i32 to index
    %c0_94 = arith.constant 0 : index
    %c0_95 = arith.constant 0 : index
    %330 = vector.load %arg6[%329, %c0_94, %c0_95] : memref<8x8x64xf32, #tpu.memory_space<vmem>>, vector<1x8x32xf32>
    %331 = vector.shape_cast %330 : vector<1x8x32xf32> to vector<8x32xf32>
    %332 = vector.shape_cast %313 : vector<8x32xf32> to vector<1x8x32xf32>
    tpu.vector_store %arg6[%329, %c0_94, %c0_95], %332 {strides = array<i32>} : memref<8x8x64xf32, #tpu.memory_space<vmem>>, vector<1x8x32xf32>,
    %333 = arith.index_cast %284 : i32 to index
    %c0_96 = arith.constant 0 : index
    %c32_97 = arith.constant 32 : index
    %334 = vector.load %arg6[%333, %c0_96, %c32_97] : memref<8x8x64xf32, #tpu.memory_space<vmem>>, vector<1x8x32xf32>
    %335 = vector.shape_cast %334 : vector<1x8x32xf32> to vector<8x32xf32>
    %336 = vector.shape_cast %328 : vector<8x32xf32> to vector<1x8x32xf32>
    tpu.vector_store %arg6[%333, %c0_96, %c32_97], %336 {strides = array<i32>} : memref<8x8x64xf32, #tpu.memory_space<vmem>>, vector<1x8x32xf32>,
    %c6_i32 = arith.constant 6 : i32
    %c7_i32_98 = arith.constant 7 : i32
    %337 = arith.subi %c7_i32_98, %c6_i32 : i32
    %c8_i32_99 = arith.constant 8 : i32
    %338 = arith.muli %c6_i32, %c8_i32_99 : i32
    %339 = tpu.assume_multiple %338, 8 : i32
    %c8_i32_100 = arith.constant 8 : i32
    %340 = arith.muli %337, %c8_i32_100 : i32
    %341 = tpu.assume_multiple %340, 8 : i32
    %342 = arith.index_cast %339 : i32 to index
    %c0_101 = arith.constant 0 : index
    %343 = vector.load %arg9[%342, %c0_101] : memref<64x256xf32, #tpu.memory_space<vmem>>, vector<8x128xf32>
    %344 = arith.truncf %313 : vector<8x32xf32> to vector<8x32xbf16>
    %cst_102 = arith.constant dense<0.000000e+00> : vector<8x128xf32>
    %345 = tpu.matmul %344, %8, %cst_102 {dimension_numbers = #tpu.dot_dimension_numbers<[1], [0], [0], [1], [0, 0, 1, 1], [], []>} : vector<8x32xbf16>, vector<32x128xbf16>, vector<8x128xf32> -> vector<8x128xf32>
    %346 = arith.addf %343, %345 : vector<8x128xf32>
    %347 = arith.index_cast %341 : i32 to index
    %c128_103 = arith.constant 128 : index
    %348 = vector.load %arg9[%347, %c128_103] : memref<64x256xf32, #tpu.memory_space<vmem>>, vector<8x128xf32>
    %349 = arith.truncf %328 : vector<8x32xf32> to vector<8x32xbf16>
    %cst_104 = arith.constant dense<0.000000e+00> : vector<8x128xf32>
    %350 = tpu.matmul %349, %10, %cst_104 {dimension_numbers = #tpu.dot_dimension_numbers<[1], [0], [0], [1], [0, 0, 1, 1], [], []>} : vector<8x32xbf16>, vector<32x128xbf16>, vector<8x128xf32> -> vector<8x128xf32>
    %351 = arith.addf %348, %350 : vector<8x128xf32>
    %352 = arith.negf %346 : vector<8x128xf32>
    %353 = math.exp %352 : vector<8x128xf32>
    %cst_105 = arith.constant 1.000000e+00 : f32
    %354 = vector.broadcast %cst_105 : f32 to vector<8x128xf32>
    %355 = arith.addf %354, %353 : vector<8x128xf32>
    %356 = arith.divf %354, %355 : vector<8x128xf32>
    %357 = math.tanh %346 : vector<8x128xf32>
    %358 = vector.extract_strided_slice %356 {offsets = [0, 0], sizes = [8, 32], strides = [1, 1]} : vector<8x128xf32> to vector<8x32xf32>
    %359 = vector.extract_strided_slice %356 {offsets = [0, 32], sizes = [8, 32], strides = [1, 1]} : vector<8x128xf32> to vector<8x32xf32>
    %360 = vector.extract_strided_slice %357 {offsets = [0, 64], sizes = [8, 32], strides = [1, 1]} : vector<8x128xf32> to vector<8x32xf32>
    %361 = vector.extract_strided_slice %356 {offsets = [0, 96], sizes = [8, 32], strides = [1, 1]} : vector<8x128xf32> to vector<8x32xf32>
    %362 = arith.mulf %359, %311 : vector<8x32xf32>
    %363 = arith.mulf %358, %360 : vector<8x32xf32>
    %364 = arith.addf %362, %363 : vector<8x32xf32>
    %365 = math.tanh %364 : vector<8x32xf32>
    %366 = arith.mulf %361, %365 : vector<8x32xf32>
    %367 = arith.negf %351 : vector<8x128xf32>
    %368 = math.exp %367 : vector<8x128xf32>
    %cst_106 = arith.constant 1.000000e+00 : f32
    %369 = vector.broadcast %cst_106 : f32 to vector<8x128xf32>
    %370 = arith.addf %369, %368 : vector<8x128xf32>
    %371 = arith.divf %369, %370 : vector<8x128xf32>
    %372 = math.tanh %351 : vector<8x128xf32>
    %373 = vector.extract_strided_slice %371 {offsets = [0, 0], sizes = [8, 32], strides = [1, 1]} : vector<8x128xf32> to vector<8x32xf32>
    %374 = vector.extract_strided_slice %371 {offsets = [0, 32], sizes = [8, 32], strides = [1, 1]} : vector<8x128xf32> to vector<8x32xf32>
    %375 = vector.extract_strided_slice %372 {offsets = [0, 64], sizes = [8, 32], strides = [1, 1]} : vector<8x128xf32> to vector<8x32xf32>
    %376 = vector.extract_strided_slice %371 {offsets = [0, 96], sizes = [8, 32], strides = [1, 1]} : vector<8x128xf32> to vector<8x32xf32>
    %377 = arith.mulf %374, %326 : vector<8x32xf32>
    %378 = arith.mulf %373, %375 : vector<8x32xf32>
    %379 = arith.addf %377, %378 : vector<8x32xf32>
    %380 = math.tanh %379 : vector<8x32xf32>
    %381 = arith.mulf %376, %380 : vector<8x32xf32>
    %382 = arith.index_cast %c6_i32 : i32 to index
    %c0_107 = arith.constant 0 : index
    %c0_108 = arith.constant 0 : index
    %383 = vector.load %arg6[%382, %c0_107, %c0_108] : memref<8x8x64xf32, #tpu.memory_space<vmem>>, vector<1x8x32xf32>
    %384 = vector.shape_cast %383 : vector<1x8x32xf32> to vector<8x32xf32>
    %385 = vector.shape_cast %366 : vector<8x32xf32> to vector<1x8x32xf32>
    tpu.vector_store %arg6[%382, %c0_107, %c0_108], %385 {strides = array<i32>} : memref<8x8x64xf32, #tpu.memory_space<vmem>>, vector<1x8x32xf32>,
    %386 = arith.index_cast %337 : i32 to index
    %c0_109 = arith.constant 0 : index
    %c32_110 = arith.constant 32 : index
    %387 = vector.load %arg6[%386, %c0_109, %c32_110] : memref<8x8x64xf32, #tpu.memory_space<vmem>>, vector<1x8x32xf32>
    %388 = vector.shape_cast %387 : vector<1x8x32xf32> to vector<8x32xf32>
    %389 = vector.shape_cast %381 : vector<8x32xf32> to vector<1x8x32xf32>
    tpu.vector_store %arg6[%386, %c0_109, %c32_110], %389 {strides = array<i32>} : memref<8x8x64xf32, #tpu.memory_space<vmem>>, vector<1x8x32xf32>,
    %c7_i32_111 = arith.constant 7 : i32
    %c7_i32_112 = arith.constant 7 : i32
    %390 = arith.subi %c7_i32_112, %c7_i32_111 : i32
    %c8_i32_113 = arith.constant 8 : i32
    %391 = arith.muli %c7_i32_111, %c8_i32_113 : i32
    %392 = tpu.assume_multiple %391, 8 : i32
    %c8_i32_114 = arith.constant 8 : i32
    %393 = arith.muli %390, %c8_i32_114 : i32
    %394 = tpu.assume_multiple %393, 8 : i32
    %395 = arith.index_cast %392 : i32 to index
    %c0_115 = arith.constant 0 : index
    %396 = vector.load %arg9[%395, %c0_115] : memref<64x256xf32, #tpu.memory_space<vmem>>, vector<8x128xf32>
    %397 = arith.truncf %366 : vector<8x32xf32> to vector<8x32xbf16>
    %cst_116 = arith.constant dense<0.000000e+00> : vector<8x128xf32>
    %398 = tpu.matmul %397, %8, %cst_116 {dimension_numbers = #tpu.dot_dimension_numbers<[1], [0], [0], [1], [0, 0, 1, 1], [], []>} : vector<8x32xbf16>, vector<32x128xbf16>, vector<8x128xf32> -> vector<8x128xf32>
    %399 = arith.addf %396, %398 : vector<8x128xf32>
    %400 = arith.index_cast %394 : i32 to index
    %c128_117 = arith.constant 128 : index
    %401 = vector.load %arg9[%400, %c128_117] : memref<64x256xf32, #tpu.memory_space<vmem>>, vector<8x128xf32>
    %402 = arith.truncf %381 : vector<8x32xf32> to vector<8x32xbf16>
    %cst_118 = arith.constant dense<0.000000e+00> : vector<8x128xf32>
    %403 = tpu.matmul %402, %10, %cst_118 {dimension_numbers = #tpu.dot_dimension_numbers<[1], [0], [0], [1], [0, 0, 1, 1], [], []>} : vector<8x32xbf16>, vector<32x128xbf16>, vector<8x128xf32> -> vector<8x128xf32>
    %404 = arith.addf %401, %403 : vector<8x128xf32>
    %405 = arith.negf %399 : vector<8x128xf32>
    %406 = math.exp %405 : vector<8x128xf32>
    %cst_119 = arith.constant 1.000000e+00 : f32
    %407 = vector.broadcast %cst_119 : f32 to vector<8x128xf32>
    %408 = arith.addf %407, %406 : vector<8x128xf32>
    %409 = arith.divf %407, %408 : vector<8x128xf32>
    %410 = math.tanh %399 : vector<8x128xf32>
    %411 = vector.extract_strided_slice %409 {offsets = [0, 0], sizes = [8, 32], strides = [1, 1]} : vector<8x128xf32> to vector<8x32xf32>
    %412 = vector.extract_strided_slice %409 {offsets = [0, 32], sizes = [8, 32], strides = [1, 1]} : vector<8x128xf32> to vector<8x32xf32>
    %413 = vector.extract_strided_slice %410 {offsets = [0, 64], sizes = [8, 32], strides = [1, 1]} : vector<8x128xf32> to vector<8x32xf32>
    %414 = vector.extract_strided_slice %409 {offsets = [0, 96], sizes = [8, 32], strides = [1, 1]} : vector<8x128xf32> to vector<8x32xf32>
    %415 = arith.mulf %412, %364 : vector<8x32xf32>
    %416 = arith.mulf %411, %413 : vector<8x32xf32>
    %417 = arith.addf %415, %416 : vector<8x32xf32>
    %418 = math.tanh %417 : vector<8x32xf32>
    %419 = arith.mulf %414, %418 : vector<8x32xf32>
    %420 = arith.negf %404 : vector<8x128xf32>
    %421 = math.exp %420 : vector<8x128xf32>
    %cst_120 = arith.constant 1.000000e+00 : f32
    %422 = vector.broadcast %cst_120 : f32 to vector<8x128xf32>
    %423 = arith.addf %422, %421 : vector<8x128xf32>
    %424 = arith.divf %422, %423 : vector<8x128xf32>
    %425 = math.tanh %404 : vector<8x128xf32>
    %426 = vector.extract_strided_slice %424 {offsets = [0, 0], sizes = [8, 32], strides = [1, 1]} : vector<8x128xf32> to vector<8x32xf32>
    %427 = vector.extract_strided_slice %424 {offsets = [0, 32], sizes = [8, 32], strides = [1, 1]} : vector<8x128xf32> to vector<8x32xf32>
    %428 = vector.extract_strided_slice %425 {offsets = [0, 64], sizes = [8, 32], strides = [1, 1]} : vector<8x128xf32> to vector<8x32xf32>
    %429 = vector.extract_strided_slice %424 {offsets = [0, 96], sizes = [8, 32], strides = [1, 1]} : vector<8x128xf32> to vector<8x32xf32>
    %430 = arith.mulf %427, %379 : vector<8x32xf32>
    %431 = arith.mulf %426, %428 : vector<8x32xf32>
    %432 = arith.addf %430, %431 : vector<8x32xf32>
    %433 = math.tanh %432 : vector<8x32xf32>
    %434 = arith.mulf %429, %433 : vector<8x32xf32>
    %435 = arith.index_cast %c7_i32_111 : i32 to index
    %c0_121 = arith.constant 0 : index
    %c0_122 = arith.constant 0 : index
    %436 = vector.load %arg6[%435, %c0_121, %c0_122] : memref<8x8x64xf32, #tpu.memory_space<vmem>>, vector<1x8x32xf32>
    %437 = vector.shape_cast %436 : vector<1x8x32xf32> to vector<8x32xf32>
    %438 = vector.shape_cast %419 : vector<8x32xf32> to vector<1x8x32xf32>
    tpu.vector_store %arg6[%435, %c0_121, %c0_122], %438 {strides = array<i32>} : memref<8x8x64xf32, #tpu.memory_space<vmem>>, vector<1x8x32xf32>,
    %439 = arith.index_cast %390 : i32 to index
    %c0_123 = arith.constant 0 : index
    %c32_124 = arith.constant 32 : index
    %440 = vector.load %arg6[%439, %c0_123, %c32_124] : memref<8x8x64xf32, #tpu.memory_space<vmem>>, vector<1x8x32xf32>
    %441 = vector.shape_cast %440 : vector<1x8x32xf32> to vector<8x32xf32>
    %442 = vector.shape_cast %434 : vector<8x32xf32> to vector<1x8x32xf32>
    tpu.vector_store %arg6[%439, %c0_123, %c32_124], %442 {strides = array<i32>} : memref<8x8x64xf32, #tpu.memory_space<vmem>>, vector<1x8x32xf32>,
    %c8_i32_125 = arith.constant 8 : i32
    %c0_126 = arith.constant 0 : index
    %c0_127 = arith.constant 0 : index
    %c0_128 = arith.constant 0 : index
    %443 = vector.load %arg7[%c0_126, %c0_127, %c0_128] : memref<2x8x32xf32, #tpu.memory_space<vmem>>, vector<1x8x32xf32>
    %444 = vector.shape_cast %443 : vector<1x8x32xf32> to vector<8x32xf32>
    %445 = vector.shape_cast %419 : vector<8x32xf32> to vector<1x8x32xf32>
    tpu.vector_store %arg7[%c0_126, %c0_127, %c0_128], %445 {strides = array<i32>} : memref<2x8x32xf32, #tpu.memory_space<vmem>>, vector<1x8x32xf32>,
    %c1_129 = arith.constant 1 : index
    %c0_130 = arith.constant 0 : index
    %c0_131 = arith.constant 0 : index
    %446 = vector.load %arg7[%c1_129, %c0_130, %c0_131] : memref<2x8x32xf32, #tpu.memory_space<vmem>>, vector<1x8x32xf32>
    %447 = vector.shape_cast %446 : vector<1x8x32xf32> to vector<8x32xf32>
    %448 = vector.shape_cast %434 : vector<8x32xf32> to vector<1x8x32xf32>
    tpu.vector_store %arg7[%c1_129, %c0_130, %c0_131], %448 {strides = array<i32>} : memref<2x8x32xf32, #tpu.memory_space<vmem>>, vector<1x8x32xf32>,
    %c0_132 = arith.constant 0 : index
    %c0_133 = arith.constant 0 : index
    %c0_134 = arith.constant 0 : index
    %449 = vector.load %arg8[%c0_132, %c0_133, %c0_134] : memref<2x8x32xf32, #tpu.memory_space<vmem>>, vector<1x8x32xf32>
    %450 = vector.shape_cast %449 : vector<1x8x32xf32> to vector<8x32xf32>
    %451 = vector.shape_cast %417 : vector<8x32xf32> to vector<1x8x32xf32>
    tpu.vector_store %arg8[%c0_132, %c0_133, %c0_134], %451 {strides = array<i32>} : memref<2x8x32xf32, #tpu.memory_space<vmem>>, vector<1x8x32xf32>,
    %c1_135 = arith.constant 1 : index
    %c0_136 = arith.constant 0 : index
    %c0_137 = arith.constant 0 : index
    %452 = vector.load %arg8[%c1_135, %c0_136, %c0_137] : memref<2x8x32xf32, #tpu.memory_space<vmem>>, vector<1x8x32xf32>
    %453 = vector.shape_cast %452 : vector<1x8x32xf32> to vector<8x32xf32>
    %454 = vector.shape_cast %432 : vector<8x32xf32> to vector<1x8x32xf32>
    tpu.vector_store %arg8[%c1_135, %c0_136, %c0_137], %454 {strides = array<i32>} : memref<2x8x32xf32, #tpu.memory_space<vmem>>, vector<1x8x32xf32>,
    return
  }
}

</mosaic_0001>

<bundles_post_ra>
// kernel: tpu_custom_call.1
= control target key start
LH: loop header
LB: loop body
LE: loop exit
PB: predicated region body
PF: predicated region fallthrough
CT: control target
= control target key end

     0   :  { %14 = vsyncpa [#allocation4], 0  ;;  %s2614_s0 = inlined_call_operand.vmem [shape: bf16[64,32], index: 0, kind: input, shape index: {}]   ;;  %s2615_s1 = inlined_call_operand.vmem [shape: bf16[32,256], index: 1, kind: input, shape index: {}]   ;;  %s2616_s2 = inlined_call_operand.hbm [shape: bf16[2,32,128], index: 2, kind: input, shape index: {}]   ;;  %s2617_s3 = inlined_call_operand.vmem [shape: f32[1,256], index: 3, kind: input, shape index: {}]   ;;  %s2618_s4 = inlined_call_operand.vmem [shape: f32[2,8,32], index: 4, kind: input, shape index: {}]   ;;  %s2619_s5 = inlined_call_operand.hbm [shape: f32[2,8,32], index: 5, kind: input, shape index: {}]   ;;  %s2620_s6 = inlined_call_operand.hbm [shape: f32[8,8,64], index: 6, kind: output, shape index: {0}]   ;;  %s2621_s7 = inlined_call_operand.hbm [shape: f32[2,8,32], index: 7, kind: output, shape index: {1}]   ;;  %s2622_s8 = inlined_call_operand.hbm [shape: f32[2,8,32], index: 8, kind: output, shape index: {2}]  }
   0x1   :  { %15 = vsyncpa [#allocation7], 0 }
   0x2   :  { %16 = vsyncpa [#allocation5], 0 }
   0x3   :  { %17 = vsyncpa [#allocation10], 0  ;;  %s2106_s27 = smov [#allocation3]  }
   0x4   :  { %s27_s28 = sshll.u32 %s2106_s27, 4  ;;  %s28_s28 = int_to_ptr.vmem [resolvable:$true] %s27_s28 }
   0x5   :  { %s2006_s29 = scalar_lea.vmem %s28_s28, 512  ;;  %p2011_p1 = scmp.lt.s32.totalorder %s28_s28, %s28_s28 }
   0x6   :  { %p2007_p0 = scmp.ne.s32.totalorder %s28_s28, %s2006_s29  ;;  %p2012_p2 = scmp.lt.s32.totalorder %s2006_s29, %s2006_s29 }
   0x8   :  { %p2013_p3 = por %p2012_p2, %p2011_p1 }
   0xa   :  { %p2014_p4 = pnand %p2013_p3, %p2007_p0 }
   0xc   :  { %2017 = shalt.err (!%p2014_p4)
}
   0xd   :  { %s2107_s30 = smov 64   ;;  %s2108_s9 = smov 4  }
   0xe   :  { %33 = dma.hbm_to_vmem [thread:$0]  %s2616_s2, 512, %s28_s28, [#allocation4], %s2107_s30, %s2107_s30, %s2108_s9  }
   0xf   :  { %s2109_s12 = smov [#allocation6]  }
  0x10   :  { %s43_s13 = sshll.u32 %s2109_s12, 4  ;;  %s44_s13 = int_to_ptr.vmem [resolvable:$true] %s43_s13 }
  0x11   :  { %s2026_s14 = scalar_lea.vmem %s44_s13, 256  ;;  %p2031_p6 = scmp.lt.s32.totalorder %s44_s13, %s44_s13 }
  0x12   :  { %p2027_p5 = scmp.ne.s32.totalorder %s44_s13, %s2026_s14  ;;  %p2032_p7 = scmp.lt.s32.totalorder %s2026_s14, %s2026_s14 }
  0x14   :  { %p2033_p8 = por %p2032_p7, %p2031_p6 }
  0x16   :  { %p2034_p9 = pnand %p2033_p8, %p2027_p5 }
  0x18   :  { %2037 = shalt.err (!%p2034_p9)
}
  0x19   :  { %s2110_s15 = smov 128   ;;  %s2111_s16 = smov 8  }
  0x1a   :  { %49 = dma.hbm_to_vmem [thread:$0]  %s2619_s5, 256, %s44_s13, [#allocation7], %s2110_s15, %s2110_s15, %s2111_s16  }
  0x1b   :  { %2098 = dma.done.wait [#allocation4], 512  }
  0x1c   :  { %2099 = vsyncadd [#allocation4], 4294966784 }
  0x1d   :  { %2100 = dma.done.wait [#allocation7], 256  }
  0x1e   :  { %2101 = vsyncadd [#allocation7], 4294967040  ;;  %v2112_v0 = vmov 0.0   ;;  %v2113_v1 = vmov 0   ;;  %vm2114_vm0 = vmmov 0   ;;  %v2185_v4 = vld [vmem:[#allocation3 + $0x8] sm:$0xff]   ;;  %v71_v19 = vlaneseq }
  0x1f   :  { %1714 = vmatprep.subr.bf16.mxu1 %v2112_v0  ;;  %166 = vmatprep.mubr.bf16.mxu0 %v2113_v1  ;;  %v1856_v2 = vld [vmem:[%s2615_s1 + $0x14] ss:$8 sps:$4 sm:$0xff]   ;;  %v1858_v3 = vld [vmem:[%s2615_s1 + $0x10] ss:$8 sps:$4 sm:$0xff]   ;;  %v1860_v5 = vld [vmem:[%s2615_s1 + $0x4] ss:$8 sps:$4 sm:$0xff]  }
  0x20   :  { %1718 = vmatprep.mubr.msk.bf16.mxu1 %vm2114_vm0, %v2112_v0  ;;  %146 = vmatprep.subr.bf16.mxu0 %v1856_v2  ;;  %v1862_v6 = vld [vmem:[%s2615_s1] ss:$8 sps:$4 sm:$0xff]   ;;  %vm121_vm1 = vcmask 261120   ;;  %v2204_v11 = vld [vmem:[#allocation3 + $0x18] sm:$0xff]   ;;  %v2211_v13 = vld [vmem:[#allocation3 + $0x10] sm:$0xff]   ;;  %s2115_s9 = smov 32  }
  0x21   :  { %147 = vmatpush1.bf16.msra.mxu0 %v1858_v3  ;;  %1715 = vmatpush3.bf16.msra.mxu1 %v2185_v4  ;;  %v2194_v7 = vld [vmem:[#allocation3] sm:$0xff]   ;;  %v1629_v14 = vld [vmem:[%s2618_s4 + $0x8] sm:$0xff]  ;;  %v1866_v17 = vld [vmem:[%s2614_s0 + $0x10] sm:$0xff]   ;;  %v72_v20 = vshrl.u32 %v71_v19, 7  ;;  %vm426_vm2 = vcmask 523520   ;;  %s2118_s2 = smov [#allocation8]  }
  0x22   :  { %148 = vmatprep.subr.bf16.mxu0 %v1860_v5  ;;  %1716 = vmatprep.subr.bf16.mxu1 %v2112_v0  ;;  %v232_v8 = vld [vmem:[%s2618_s4] sm:$0xff]  ;;  %v1865_v15 = vld [vmem:[%s2614_s0 + $0x8] sm:$0xff]   ;;  %v303_v16 = vpack.c.bf16 %v1629_v14, %v1629_v14  ;;  %v1869_v18 = vld [vmem:[%s2614_s0 + $0x18] sm:$0xff]   ;;  %s1566_s19 = sshll.u32 %s2118_s2, 4  ;;  %s2119_s20 = smov [#allocation11]   ;;  %s1567_s19 = int_to_ptr.vmem [resolvable:$true] %s1566_s19 }
  0x23   :  { %v1864_v9 = vld [vmem:[%s2614_s0] sm:$0xff]   ;;  %v242_v10 = vpack.c.bf16 %v232_v8, %v232_v8  ;;  %v73_v21 = vsub.s32 0, %v72_v20  ;;  %v77_v23 = vsub.s32 1, %v72_v20  ;;  %s2116_s0 = smov 96   ;;  %s1590_s21 = sshll.u32 %s2119_s20, 4  ;;  %s2587_s21 = int_to_ptr.vmem [resolvable:$true] %s1590_s21 }
  0x24   :  { %v233_v12 = vld [vmem:[#allocation6] sm:$0xff] }
  0x25   :  { %149 = vmatpush1.bf16.msra.mxu0 %v1862_v6  ;;  %1717 = vmatpush3.bf16.msra.mxu1 %v2194_v7  ;;  %v69_v22 = vld [vmem:[%s2617_s3] sm:$0x3]  ;;  %s2117_s3 = smov [#allocation9]  }
  0x26   :  { %1746 = vmatprep.subr.bf16.mxu0 %v2112_v0  ;;  %1722 = vmatprep.subr.bf16.mxu1 %v2112_v0  ;;  %v74_v24 = vrot.slane %v69_v22, %v73_v21  ;;  %v78_v25 = vrot.slane %v69_v22, %v77_v23 }
  0x27   :  { %368 = vrot.lane.b32.xlu1 %v233_v12, %s2115_s9 }
  0x28   :  { %1625 = vmatmul.mubr.msk.bf16.vlgmr.msra.gmra.mxu0 %vm121_vm1, %v1864_v9  ;;  %1719 = vmatmul.mubr.msk.bf16.vlgmr.msra.gmra.mxu1 %vm121_vm1, %v242_v10  ;;  %v237_v9 = vld [vmem:[#allocation6 + $0x8] sm:$0xff] }
  0x29   :  { %176 = vmatprep.mubr.bf16.mxu0 %v2113_v1  ;;  %1723 = vmatpush3.bf16.msra.mxu1 %v2204_v11 }
  0x2a   :  { %1726 = vmatprep.mubr.msk.bf16.mxu1 %vm2114_vm0, %v2112_v0  ;;  %1724 = vmatprep.subr.bf16.mxu1 %v2112_v0 }
  0x2b   :  { %1747 = vmatpush3.bf16.msra.mxu0 %v2185_v4 }
  0x2c   :  { %1748 = vmatprep.subr.bf16.mxu0 %v2112_v0 }
  0x2d   :  { %1725 = vmatpush3.bf16.msra.mxu1 %v2211_v13 }
  0x2e   :  { %1730 = vmatprep.subr.bf16.mxu1 %v2112_v0 }
  0x2f   :  { %1749 = vmatpush3.bf16.msra.mxu0 %v2194_v7 }
  0x30   :  { %1626 = vmatmul.mubr.msk.bf16.gmra.mxu0 %vm121_vm1, %v1865_v15  ;;  %1727 = vmatmul.mubr.msk.bf16.vlgmr.msra.gmra.mxu1 %vm121_vm1, %v303_v16 }
  0x31   :  { %186 = vmatprep.mubr.bf16.mxu0 %v2113_v1  ;;  %1731 = vmatpush3.bf16.msra.mxu1 %v2185_v4 }
  0x32   :  { %1734 = vmatprep.mubr.msk.bf16.mxu1 %vm2114_vm0, %v2112_v0  ;;  %1732 = vmatprep.subr.bf16.mxu1 %v2112_v0 }
  0x33   :  { %1762 = vmatprep.subr.bf16.mxu0 %v2112_v0 }
  0x35   :  { %1733 = vmatpush3.bf16.msra.mxu1 %v2194_v7 }
  0x36   :  { %1738 = vmatprep.subr.bf16.mxu1 %v2112_v0 }
  0x38   :  { %1627 = vmatmul.mubr.msk.bf16.gmra.mxu0 %vm121_vm1, %v1866_v17 }
  0x39   :  { %196 = vmatprep.mubr.bf16.mxu0 %v2113_v1 }
  0x40   :  { %1628 = vmatmul.mubr.msk.bf16.gmra.mxu0 %vm121_vm1, %v1869_v18 }
  0x41   :  { %1750 = vmatprep.mubr.msk.bf16.mxu0 %vm2114_vm0, %v2112_v0 }
  0xe8   :  { %v168_v26 = vpop.f32.mrf.mxu0  ;;  %v292_v28 = vpop.f32.mrf.mxu1 }
  0xe9   :  { %v169_v27 = vadd.f32 %v168_v26, %v74_v24 }
  0xea   :  { %v170_v29 = vpop.f32.mrf.mxu0  ;;  %v1720_v32 = vpop.f32.mrf.mxu1 }
  0xeb   :  { %v2250_v30 = vadd.f32 %v170_v29, %v78_v25  ;;  %v298_v31 = vadd.f32 %v292_v28, %v169_v27 }
  0xec   :  { %v172_v33 = vpop.f32.mrf.mxu0  ;;  %v295_v35 = vpop.f32.mrf.mxu1 }
  0xed   :  { %1870 = vtanh.f32 %v298_v31  ;;  %v2252_v34 = vadd.f32 %v172_v33, %v74_v24  ;;  %v1636_v10 = vmul.f32 -1.442695, %v298_v31 }
  0xee   :  { %v174_v36 = vpop.f32.mrf.mxu0  ;;  %v1721_v38 = vpop.f32.mrf.mxu1 }
  0xef   :  { %v2254_v37 = vadd.f32 %v174_v36, %v78_v25 }
  0xf0   :  { %v178_v39 = vpop.f32.mrf.mxu0  ;;  %v353_v41 = vpop.f32.mrf.mxu1 }
  0xf1   :  { %v2256_v40 = vadd.f32 %v178_v39, %v74_v24 }
  0xf2   :  { %v180_v42 = vpop.f32.mrf.mxu0  ;;  %v1728_v44 = vpop.f32.mrf.mxu1 }
  0xf3   :  { %v2258_v43 = vadd.f32 %v180_v42, %v78_v25 }
  0xf4   :  { %v182_v45 = vpop.f32.mrf.mxu0  ;;  %v356_v47 = vpop.f32.mrf.mxu1 }
  0xf5   :  { %v2260_v46 = vadd.f32 %v182_v45, %v74_v24 }
  0xf6   :  { %v184_v48 = vpop.f32.mrf.mxu0  ;;  %v1729_v50 = vpop.f32.mrf.mxu1 }
  0xf7   :  { %v2262_v49 = vadd.f32 %v184_v48, %v78_v25 }
  0xf8   :  { %v188_v51 = vpop.f32.mrf.mxu0 }
  0xf9   :  { %v2264_v52 = vadd.f32 %v188_v51, %v74_v24 }
  0xfa   :  { %v1871_v53 = vpop.eup %1870  ;;  %v190_v54 = vpop.f32.mrf.mxu0 }
  0xfb   :  { %v2266_v55 = vadd.f32 %v190_v54, %v78_v25  ;;  %373 = vrot.lane.b32.xlu0 %v1871_v53, %s2107_s30 }
  0xfc   :  { %v192_v56 = vpop.f32.mrf.mxu0 }
  0xfd   :  { %v2269_v57 = vadd.f32 %v192_v56, %v74_v24 }
  0xfe   :  { %v194_v58 = vpop.f32.mrf.mxu0 }
  0xff   :  { %v2271_v59 = vadd.f32 %v194_v58, %v78_v25 }
 0x100   :  { %v198_v60 = vpop.f32.mrf.mxu0 }
 0x101   :  { %v2273_v61 = vadd.f32 %v198_v60, %v74_v24 }
 0x102   :  { %v200_v62 = vpop.f32.mrf.mxu0 }
 0x103   :  { %v2275_v63 = vadd.f32 %v200_v62, %v78_v25 }
 0x104   :  { %v202_v1 = vpop.f32.mrf.mxu0 }
 0x105   :  { %v2277_v2 = vadd.f32 %v202_v1, %v74_v24  ;;  %v369_v24 = vpop.permute.xlu1 %368 }
 0x106   :  { %v204_v3 = vpop.f32.mrf.mxu0 }
 0x107   :  { %v205_v5 = vadd.f32 %v204_v3, %v78_v25 }
 0x109   :  { %v359_v6 = vadd.f32 %v353_v41, %v205_v5 }
 0x10b   :  { %1872 = vtanh.f32 %v359_v6  ;;  %v1637_v15 = vmul.f32 -1.442695, %v359_v6 }
 0x10c   :  { %1874 = vpow2.f32 %v1636_v10 }
 0x118   :  { %v1873_v8 = vpop.eup %1872 }
 0x119   :  { %401 = vrot.lane.b32.xlu0 %v1873_v8, %s2107_s30  ;;  %v1875_v12 = vpop.eup %1874 }
 0x11a   :  { %v363_v14 = vadd.f32 1.0, %v1875_v12 }
 0x11c   :  { %1876 = vrcp.f32 %v363_v14 }
 0x11d   :  { %396 = vrot.lane.b32.xlu0 %v237_v9, %s2115_s9  ;;  %1878 = vpow2.f32 %v1637_v15 }
 0x129   :  { %v1877_v16 = vpop.eup %1876 }
 0x12a   :  { %v1879_v19 = vpop.eup %1878  ;;  %v371_v25 = vmul.f32 %v1877_v16, %v369_v24 }
 0x12b   :  { %v391_v20 = vadd.f32 1.0, %v1879_v19 }
 0x12d   :  { %1880 = vrcp.f32 %v391_v20 }
 0x13a   :  { %v1881_v21 = vpop.eup %1880 }
 0x16d   :  { %v374_v17 = vpop.permute.xlu0 %373 }
 0x16e   :  { %v376_v18 = vmul.f32 %v1877_v16, %v374_v17 }
 0x170   :  { %378 = vrot.lane.b32.xlu1 %v376_v18, %s2115_s9 }
 0x18b   :  { %v402_v22 = vpop.permute.xlu0 %401 }
 0x18c   :  { %v404_v23 = vmul.f32 %v1881_v21, %v402_v22 }
 0x18e   :  { %406 = vrot.lane.b32.xlu1 %v404_v23, %s2115_s9 }
 0x18f   :  { %v397_v29 = vpop.permute.xlu0 %396 }
 0x190   :  { %v399_v31 = vmul.f32 %v1881_v21, %v397_v29 }
 0x1e2   :  { %v379_v26 = vpop.permute.xlu1 %378 }
 0x1e3   :  { %v2283_v27 = vadd.f32 %v379_v26, %v371_v25 }
 0x1e5   :  { %1882 = vtanh.f32 %v2283_v27 }
 0x1f2   :  { %v1883_v28 = vpop.eup %1882 }
 0x1f3   :  { %384 = vrot.lane.b32.xlu0 %v1883_v28, %s2107_s30 }
 0x200   :  { %v407_v32 = vpop.permute.xlu1 %406 }
 0x201   :  { %v2287_v33 = vadd.f32 %v407_v32, %v399_v31 }
 0x203   :  { %1884 = vtanh.f32 %v2287_v33 }
 0x210   :  { %v1885_v35 = vpop.eup %1884 }
 0x211   :  { %412 = vrot.lane.b32.xlu1 %v1885_v35, %s2107_s30 }
 0x265   :  { %v385_v36 = vpop.permute.xlu0 %384 }
 0x266   :  { %v2291_v38 = vmul.f32 %v1877_v16, %v385_v36 }
 0x268   :  { %v432_v39 = vpack.c.bf16 %v2291_v38, %v2291_v38 }
 0x26a   :  { %434 = vrot.lane.b32.xlu0 %v432_v39, %s2115_s9 }
 0x283   :  { %v413_v41 = vpop.permute.xlu1 %412 }
 0x284   :  { %v2296_v42 = vmul.f32 %v1881_v21, %v413_v41 }
 0x286   :  { %v484_v44 = vpack.c.bf16 %v2296_v42, %v2296_v42 }
 0x288   :  { %486 = vrot.lane.b32.xlu1 %v484_v44, %s2115_s9 }
 0x2dc   :  { %v435_v45 = vpop.permute.xlu0 %434 }
 0x2dd   :  { %1735 = vmatmul.mubr.msk.bf16.vlgmr.msra.gmra.mxu1 %vm121_vm1, %v435_v45 }
 0x2de   :  { %1739 = vmatpush3.bf16.msra.mxu1 %v2204_v11  ;;  %1742 = vmatprep.mubr.msk.bf16.mxu1 %vm2114_vm0, %v2112_v0 }
 0x2df   :  { %1740 = vmatprep.subr.bf16.mxu1 %v2112_v0 }
 0x2e2   :  { %1741 = vmatpush3.bf16.msra.mxu1 %v2211_v13 }
 0x2e3   :  { %1754 = vmatprep.subr.bf16.mxu1 %v2112_v0 }
 0x2fa   :  { %v487_v47 = vpop.permute.xlu1 %486 }
 0x2fb   :  { %1743 = vmatmul.mubr.msk.bf16.vlgmr.msra.gmra.mxu1 %vm121_vm1, %v487_v47 }
 0x2fc   :  { %1755 = vmatpush3.bf16.msra.mxu1 %v2204_v11  ;;  %1758 = vmatprep.mubr.msk.bf16.mxu1 %vm2114_vm0, %v2112_v0 }
 0x2fd   :  { %1756 = vmatprep.subr.bf16.mxu1 %v2112_v0 }
 0x300   :  { %1757 = vmatpush3.bf16.msra.mxu1 %v2211_v13 }
 0x301   :  { %1770 = vmatprep.subr.bf16.mxu1 %v2112_v0 }
 0x39d   :  { %v473_v48 = vpop.f32.mrf.mxu1 }
 0x39e   :  { %v479_v50 = vadd.f32 %v473_v48, %v2252_v34 }
 0x39f   :  { %v1736_v51 = vpop.f32.mrf.mxu1 }
 0x3a0   :  { %1886 = vtanh.f32 %v479_v50  ;;  %v1640_v6 = vmul.f32 -1.442695, %v479_v50 }
 0x3a1   :  { %v476_v53 = vpop.f32.mrf.mxu1 }
 0x3a3   :  { %v1737_v54 = vpop.f32.mrf.mxu1 }
 0x3ad   :  { %v1887_v56 = vpop.eup %1886 }
 0x3ae   :  { %541 = vrot.lane.b32.xlu0 %v1887_v56, %s2107_s30 }
 0x3bb   :  { %v525_v58 = vpop.f32.mrf.mxu1 }
 0x3bc   :  { %v531_v60 = vadd.f32 %v525_v58, %v2275_v63 }
 0x3bd   :  { %v1744_v62 = vpop.f32.mrf.mxu1 }
 0x3be   :  { %1888 = vtanh.f32 %v531_v60  ;;  %v1641_v9 = vmul.f32 -1.442695, %v531_v60 }
 0x3bf   :  { %v528_v1 = vpop.f32.mrf.mxu1  ;;  %1890 = vpow2.f32 %v1640_v6 }
 0x3c1   :  { %v1745_v3 = vpop.f32.mrf.mxu1 }
 0x3cb   :  { %v1889_v5 = vpop.eup %1888 }
 0x3cc   :  { %565 = vrot.lane.b32.xlu1 %v1889_v5, %s2107_s30  ;;  %v1891_v34 = vpop.eup %1890 }
 0x3cd   :  { %v535_v8 = vadd.f32 1.0, %v1891_v34 }
 0x3cf   :  { %1892 = vrcp.f32 %v535_v8 }
 0x3d0   :  { %1894 = vpow2.f32 %v1641_v9 }
 0x3dc   :  { %v1893_v10 = vpop.eup %1892 }
 0x3dd   :  { %v1895_v63 = vpop.eup %1894  ;;  %v539_v19 = vmul.f32 %v1893_v10, %v2283_v27 }
 0x3de   :  { %v559_v15 = vadd.f32 1.0, %v1895_v63 }
 0x3e0   :  { %1896 = vrcp.f32 %v559_v15 }
 0x3ed   :  { %v1897_v16 = vpop.eup %1896 }
 0x3ee   :  { %v563_v23 = vmul.f32 %v1897_v16, %v2287_v33 }
 0x420   :  { %v542_v12 = vpop.permute.xlu0 %541 }
 0x421   :  { %v544_v14 = vmul.f32 %v1893_v10, %v542_v12 }
 0x423   :  { %546 = vrot.lane.b32.xlu0 %v544_v14, %s2115_s9 }
 0x43e   :  { %v566_v17 = vpop.permute.xlu1 %565 }
 0x43f   :  { %v568_v18 = vmul.f32 %v1897_v16, %v566_v17 }
 0x441   :  { %570 = vrot.lane.b32.xlu1 %v568_v18, %s2115_s9 }
 0x495   :  { %v547_v20 = vpop.permute.xlu0 %546 }
 0x496   :  { %v2322_v21 = vadd.f32 %v547_v20, %v539_v19 }
 0x498   :  { %1898 = vtanh.f32 %v2322_v21 }
 0x4a5   :  { %v1899_v22 = vpop.eup %1898 }
 0x4a6   :  { %552 = vrot.lane.b32.xlu0 %v1899_v22, %s2107_s30 }
 0x4b3   :  { %v571_v24 = vpop.permute.xlu1 %570 }
 0x4b4   :  { %v2327_v25 = vadd.f32 %v571_v24, %v563_v23 }
 0x4b6   :  { %1900 = vtanh.f32 %v2327_v25 }
 0x4c3   :  { %v1901_v26 = vpop.eup %1900 }
 0x4c4   :  { %576 = vrot.lane.b32.xlu1 %v1901_v26, %s2107_s30 }
 0x518   :  { %v553_v28 = vpop.permute.xlu0 %552 }
 0x519   :  { %v2331_v27 = vmul.f32 %v1893_v10, %v553_v28 }
 0x51b   :  { %v596_v29 = vpack.c.bf16 %v2331_v27, %v2331_v27 }
 0x51d   :  { %598 = vrot.lane.b32.xlu0 %v596_v29, %s2115_s9 }
 0x536   :  { %v577_v31 = vpop.permute.xlu1 %576 }
 0x537   :  { %v2336_v32 = vmul.f32 %v1897_v16, %v577_v31 }
 0x539   :  { %v648_v33 = vpack.c.bf16 %v2336_v32, %v2336_v32 }
 0x53b   :  { %650 = vrot.lane.b32.xlu1 %v648_v33, %s2115_s9 }
 0x58f   :  { %v599_v35 = vpop.permute.xlu0 %598 }
 0x590   :  { %1751 = vmatmul.mubr.msk.bf16.vlgmr.msra.gmra.mxu0 %vm121_vm1, %v599_v35 }
 0x591   :  { %1763 = vmatpush3.bf16.msra.mxu0 %v2185_v4  ;;  %1766 = vmatprep.mubr.msk.bf16.mxu0 %vm2114_vm0, %v2112_v0 }
 0x592   :  { %1764 = vmatprep.subr.bf16.mxu0 %v2112_v0 }
 0x595   :  { %1765 = vmatpush3.bf16.msra.mxu0 %v2194_v7 }
 0x596   :  { %1778 = vmatprep.subr.bf16.mxu0 %v2112_v0 }
 0x5ad   :  { %v651_v36 = vpop.permute.xlu1 %650 }
 0x5ae   :  { %1759 = vmatmul.mubr.msk.bf16.vlgmr.msra.gmra.mxu1 %vm121_vm1, %v651_v36 }
 0x5af   :  { %1771 = vmatpush3.bf16.msra.mxu1 %v2204_v11  ;;  %1774 = vmatprep.mubr.msk.bf16.mxu1 %vm2114_vm0, %v2112_v0 }
 0x5b0   :  { %1772 = vmatprep.subr.bf16.mxu1 %v2112_v0 }
 0x5b3   :  { %1773 = vmatpush3.bf16.msra.mxu1 %v2211_v13 }
 0x5b4   :  { %1786 = vmatprep.subr.bf16.mxu1 %v2112_v0 }
 0x650   :  { %v637_v39 = vpop.f32.mrf.mxu0 }
 0x651   :  { %v643_v41 = vadd.f32 %v637_v39, %v2256_v40 }
 0x652   :  { %v1752_v44 = vpop.f32.mrf.mxu0 }
 0x653   :  { %1902 = vtanh.f32 %v643_v41  ;;  %v1644_v60 = vmul.f32 -1.442695, %v643_v41 }
 0x654   :  { %v640_v45 = vpop.f32.mrf.mxu0 }
 0x656   :  { %v1753_v47 = vpop.f32.mrf.mxu0 }
 0x660   :  { %v1903_v48 = vpop.eup %1902 }
 0x661   :  { %705 = vrot.lane.b32.xlu0 %v1903_v48, %s2107_s30 }
 0x66e   :  { %v689_v50 = vpop.f32.mrf.mxu1 }
 0x66f   :  { %v695_v51 = vadd.f32 %v689_v50, %v2271_v59 }
 0x670   :  { %v1760_v53 = vpop.f32.mrf.mxu1 }
 0x671   :  { %1904 = vtanh.f32 %v695_v51  ;;  %v1645_v1 = vmul.f32 -1.442695, %v695_v51 }
 0x672   :  { %v692_v54 = vpop.f32.mrf.mxu1  ;;  %1906 = vpow2.f32 %v1644_v60 }
 0x674   :  { %v1761_v56 = vpop.f32.mrf.mxu1 }
 0x67e   :  { %v1905_v58 = vpop.eup %1904 }
 0x67f   :  { %729 = vrot.lane.b32.xlu1 %v1905_v58, %s2107_s30  ;;  %v1907_v40 = vpop.eup %1906 }
 0x680   :  { %v699_v62 = vadd.f32 1.0, %v1907_v40 }
 0x682   :  { %1908 = vrcp.f32 %v699_v62 }
 0x683   :  { %1910 = vpow2.f32 %v1645_v1 }
 0x68f   :  { %v1909_v3 = vpop.eup %1908 }
 0x690   :  { %v1911_v59 = vpop.eup %1910  ;;  %v703_v12 = vmul.f32 %v1909_v3, %v2322_v21 }
 0x691   :  { %v723_v34 = vadd.f32 1.0, %v1911_v59 }
 0x693   :  { %1912 = vrcp.f32 %v723_v34 }
 0x6a0   :  { %v1913_v8 = vpop.eup %1912 }
 0x6a1   :  { %v727_v16 = vmul.f32 %v1913_v8, %v2327_v25 }
 0x6d3   :  { %v706_v5 = vpop.permute.xlu0 %705 }
 0x6d4   :  { %v708_v6 = vmul.f32 %v1909_v3, %v706_v5 }
 0x6d6   :  { %710 = vrot.lane.b32.xlu0 %v708_v6, %s2115_s9 }
 0x6f1   :  { %v730_v9 = vpop.permute.xlu1 %729 }
 0x6f2   :  { %v732_v10 = vmul.f32 %v1913_v8, %v730_v9 }
 0x6f4   :  { %734 = vrot.lane.b32.xlu1 %v732_v10, %s2115_s9 }
 0x748   :  { %v711_v14 = vpop.permute.xlu0 %710 }
 0x749   :  { %v2362_v63 = vadd.f32 %v711_v14, %v703_v12 }
 0x74b   :  { %1914 = vtanh.f32 %v2362_v63 }
 0x758   :  { %v1915_v15 = vpop.eup %1914 }
 0x759   :  { %716 = vrot.lane.b32.xlu0 %v1915_v15, %s2107_s30 }
 0x766   :  { %v735_v17 = vpop.permute.xlu1 %734 }
 0x767   :  { %v2367_v18 = vadd.f32 %v735_v17, %v727_v16 }
 0x769   :  { %1916 = vtanh.f32 %v2367_v18 }
 0x776   :  { %v1917_v19 = vpop.eup %1916 }
 0x777   :  { %740 = vrot.lane.b32.xlu1 %v1917_v19, %s2107_s30 }
 0x7cb   :  { %v717_v20 = vpop.permute.xlu0 %716 }
 0x7cc   :  { %v2371_v21 = vmul.f32 %v1909_v3, %v717_v20 }
 0x7ce   :  { %v760_v22 = vpack.c.bf16 %v2371_v21, %v2371_v21 }
 0x7d0   :  { %762 = vrot.lane.b32.xlu0 %v760_v22, %s2115_s9 }
 0x7e9   :  { %v741_v23 = vpop.permute.xlu1 %740 }
 0x7ea   :  { %v2376_v24 = vmul.f32 %v1913_v8, %v741_v23 }
 0x7ec   :  { %v812_v25 = vpack.c.bf16 %v2376_v24, %v2376_v24 }
 0x7ee   :  { %814 = vrot.lane.b32.xlu1 %v812_v25, %s2115_s9 }
 0x842   :  { %v763_v26 = vpop.permute.xlu0 %762 }
 0x843   :  { %1767 = vmatmul.mubr.msk.bf16.vlgmr.msra.gmra.mxu0 %vm121_vm1, %v763_v26 }
 0x844   :  { %1779 = vmatpush3.bf16.msra.mxu0 %v2185_v4  ;;  %1782 = vmatprep.mubr.msk.bf16.mxu0 %vm2114_vm0, %v2112_v0 }
 0x845   :  { %1780 = vmatprep.subr.bf16.mxu0 %v2112_v0 }
 0x848   :  { %1781 = vmatpush3.bf16.msra.mxu0 %v2194_v7 }
 0x849   :  { %1794 = vmatprep.subr.bf16.mxu0 %v2112_v0 }
 0x860   :  { %v815_v28 = vpop.permute.xlu1 %814 }
 0x861   :  { %1775 = vmatmul.mubr.msk.bf16.vlgmr.msra.gmra.mxu1 %vm121_vm1, %v815_v28 }
 0x862   :  { %1787 = vmatpush3.bf16.msra.mxu1 %v2204_v11  ;;  %1790 = vmatprep.mubr.msk.bf16.mxu1 %vm2114_vm0, %v2112_v0 }
 0x863   :  { %1788 = vmatprep.subr.bf16.mxu1 %v2112_v0 }
 0x866   :  { %1789 = vmatpush3.bf16.msra.mxu1 %v2211_v13 }
 0x867   :  { %1802 = vmatprep.subr.bf16.mxu1 %v2112_v0 }
 0x903   :  { %v801_v29 = vpop.f32.mrf.mxu0 }
 0x904   :  { %v807_v31 = vadd.f32 %v801_v29, %v2260_v46 }
 0x905   :  { %v1768_v33 = vpop.f32.mrf.mxu0 }
 0x906   :  { %1918 = vtanh.f32 %v807_v31  ;;  %v1648_v51 = vmul.f32 -1.442695, %v807_v31 }
 0x907   :  { %v804_v35 = vpop.f32.mrf.mxu0 }
 0x909   :  { %v1769_v36 = vpop.f32.mrf.mxu0 }
 0x913   :  { %v1919_v39 = vpop.eup %1918 }
 0x914   :  { %869 = vrot.lane.b32.xlu0 %v1919_v39, %s2107_s30 }
 0x921   :  { %v853_v41 = vpop.f32.mrf.mxu1 }
 0x922   :  { %v859_v44 = vadd.f32 %v853_v41, %v2266_v55 }
 0x923   :  { %v1776_v45 = vpop.f32.mrf.mxu1 }
 0x924   :  { %1920 = vtanh.f32 %v859_v44  ;;  %v1649_v54 = vmul.f32 -1.442695, %v859_v44 }
 0x925   :  { %v856_v47 = vpop.f32.mrf.mxu1  ;;  %1922 = vpow2.f32 %v1648_v51 }
 0x927   :  { %v1777_v48 = vpop.f32.mrf.mxu1 }
 0x931   :  { %v1921_v50 = vpop.eup %1920 }
 0x932   :  { %893 = vrot.lane.b32.xlu1 %v1921_v50, %s2107_s30  ;;  %v1923_v46 = vpop.eup %1922 }
 0x933   :  { %v863_v53 = vadd.f32 1.0, %v1923_v46 }
 0x935   :  { %1924 = vrcp.f32 %v863_v53 }
 0x936   :  { %1926 = vpow2.f32 %v1649_v54 }
 0x942   :  { %v1925_v56 = vpop.eup %1924 }
 0x943   :  { %v1927_v55 = vpop.eup %1926  ;;  %v867_v5 = vmul.f32 %v1925_v56, %v2362_v63 }
 0x944   :  { %v887_v40 = vadd.f32 1.0, %v1927_v55 }
 0x946   :  { %1928 = vrcp.f32 %v887_v40 }
 0x953   :  { %v1929_v62 = vpop.eup %1928 }
 0x954   :  { %v891_v8 = vmul.f32 %v1929_v62, %v2367_v18 }
 0x986   :  { %v870_v58 = vpop.permute.xlu0 %869 }
 0x987   :  { %v872_v60 = vmul.f32 %v1925_v56, %v870_v58 }
 0x989   :  { %874 = vrot.lane.b32.xlu0 %v872_v60, %s2115_s9 }
 0x9a4   :  { %v894_v1 = vpop.permute.xlu1 %893 }
 0x9a5   :  { %v896_v3 = vmul.f32 %v1929_v62, %v894_v1 }
 0x9a7   :  { %898 = vrot.lane.b32.xlu1 %v896_v3, %s2115_s9 }
 0x9fb   :  { %v875_v6 = vpop.permute.xlu0 %874 }
 0x9fc   :  { %v2402_v59 = vadd.f32 %v875_v6, %v867_v5 }
 0x9fe   :  { %1930 = vtanh.f32 %v2402_v59 }
 0xa0b   :  { %v1931_v34 = vpop.eup %1930 }
 0xa0c   :  { %880 = vrot.lane.b32.xlu0 %v1931_v34, %s2107_s30 }
 0xa19   :  { %v899_v9 = vpop.permute.xlu1 %898 }
 0xa1a   :  { %v2407_v10 = vadd.f32 %v899_v9, %v891_v8 }
 0xa1c   :  { %1932 = vtanh.f32 %v2407_v10 }
 0xa29   :  { %v1933_v12 = vpop.eup %1932 }
 0xa2a   :  { %904 = vrot.lane.b32.xlu1 %v1933_v12, %s2107_s30 }
 0xa7e   :  { %v881_v14 = vpop.permute.xlu0 %880 }
 0xa7f   :  { %v2411_v63 = vmul.f32 %v1925_v56, %v881_v14 }
 0xa81   :  { %v921_v15 = vpack.c.bf16 %v2411_v63, %v2411_v63 }
 0xa83   :  { %923 = vrot.lane.b32.xlu0 %v921_v15, %s2115_s9 }
 0xa9c   :  { %v905_v16 = vpop.permute.xlu1 %904 }
 0xa9d   :  { %v2416_v17 = vmul.f32 %v1929_v62, %v905_v16 }
 0xa9f   :  { %v970_v18 = vpack.c.bf16 %v2416_v17, %v2416_v17 }
 0xaa1   :  { %972 = vrot.lane.b32.xlu1 %v970_v18, %s2115_s9 }
 0xaf5   :  { %v924_v19 = vpop.permute.xlu0 %923 }
 0xaf6   :  { %1783 = vmatmul.mubr.msk.bf16.vlgmr.msra.gmra.mxu0 %vm121_vm1, %v924_v19 }
 0xaf7   :  { %1795 = vmatpush3.bf16.msra.mxu0 %v2185_v4  ;;  %1798 = vmatprep.mubr.msk.bf16.mxu0 %vm2114_vm0, %v2112_v0 }
 0xaf8   :  { %1796 = vmatprep.subr.bf16.mxu0 %v2112_v0 }
 0xafb   :  { %1797 = vmatpush3.bf16.msra.mxu0 %v2194_v7 }
 0xafc   :  { %1810 = vmatprep.subr.bf16.mxu0 %v2112_v0 }
 0xb13   :  { %v973_v20 = vpop.permute.xlu1 %972 }
 0xb14   :  { %1791 = vmatmul.mubr.msk.bf16.vlgmr.msra.gmra.mxu1 %vm121_vm1, %v973_v20 }
 0xb15   :  { %1803 = vmatpush3.bf16.msra.mxu1 %v2204_v11  ;;  %1806 = vmatprep.mubr.msk.bf16.mxu1 %vm2114_vm0, %v2112_v0 }
 0xb16   :  { %1804 = vmatprep.subr.bf16.mxu1 %v2112_v0 }
 0xb19   :  { %1805 = vmatpush3.bf16.msra.mxu1 %v2211_v13 }
 0xb1a   :  { %1818 = vmatprep.subr.bf16.mxu1 %v2112_v0 }
 0xbb6   :  { %v962_v22 = vpop.f32.mrf.mxu0 }
 0xbb7   :  { %v968_v23 = vadd.f32 %v962_v22, %v2264_v52 }
 0xbb8   :  { %v1784_v25 = vpop.f32.mrf.mxu0 }
 0xbb9   :  { %1934 = vtanh.f32 %v968_v23  ;;  %v1652_v44 = vmul.f32 -1.442695, %v968_v23 }
 0xbba   :  { %v965_v26 = vpop.f32.mrf.mxu0 }
 0xbbc   :  { %v1785_v28 = vpop.f32.mrf.mxu0 }
 0xbc6   :  { %v1935_v29 = vpop.eup %1934 }
 0xbc7   :  { %1027 = vrot.lane.b32.xlu0 %v1935_v29, %s2107_s30 }
 0xbd4   :  { %v1011_v31 = vpop.f32.mrf.mxu1 }
 0xbd5   :  { %v1017_v33 = vadd.f32 %v1011_v31, %v2262_v49 }
 0xbd6   :  { %v1792_v35 = vpop.f32.mrf.mxu1 }
 0xbd7   :  { %1936 = vtanh.f32 %v1017_v33  ;;  %v1653_v47 = vmul.f32 -1.442695, %v1017_v33 }
 0xbd8   :  { %v1014_v36 = vpop.f32.mrf.mxu1  ;;  %1938 = vpow2.f32 %v1652_v44 }
 0xbda   :  { %v1793_v39 = vpop.f32.mrf.mxu1 }
 0xbe4   :  { %v1937_v41 = vpop.eup %1936 }
 0xbe5   :  { %1051 = vrot.lane.b32.xlu1 %v1937_v41, %s2107_s30  ;;  %v1939_v52 = vpop.eup %1938 }
 0xbe6   :  { %v1021_v45 = vadd.f32 1.0, %v1939_v52 }
 0xbe8   :  { %1940 = vrcp.f32 %v1021_v45 }
 0xbe9   :  { %1942 = vpow2.f32 %v1653_v47 }
 0xbf5   :  { %v1941_v48 = vpop.eup %1940 }
 0xbf6   :  { %v1943_v49 = vpop.eup %1942  ;;  %v1025_v58 = vmul.f32 %v1941_v48, %v2402_v59 }
 0xbf7   :  { %v1045_v46 = vadd.f32 1.0, %v1943_v49 }
 0xbf9   :  { %1944 = vrcp.f32 %v1045_v46 }
 0xc06   :  { %v1945_v53 = vpop.eup %1944 }
 0xc07   :  { %v1049_v62 = vmul.f32 %v1945_v53, %v2407_v10 }
 0xc39   :  { %v1028_v50 = vpop.permute.xlu0 %1027 }
 0xc3a   :  { %v1030_v51 = vmul.f32 %v1941_v48, %v1028_v50 }
 0xc3c   :  { %1032 = vrot.lane.b32.xlu0 %v1030_v51, %s2115_s9 }
 0xc57   :  { %v1052_v54 = vpop.permute.xlu1 %1051 }
 0xc58   :  { %v1054_v56 = vmul.f32 %v1945_v53, %v1052_v54 }
 0xc5a   :  { %1056 = vrot.lane.b32.xlu1 %v1054_v56, %s2115_s9 }
 0xcae   :  { %v1033_v60 = vpop.permute.xlu0 %1032 }
 0xcaf   :  { %v2442_v55 = vadd.f32 %v1033_v60, %v1025_v58 }
 0xcb1   :  { %1946 = vtanh.f32 %v2442_v55 }
 0xcbe   :  { %v1947_v40 = vpop.eup %1946 }
 0xcbf   :  { %1038 = vrot.lane.b32.xlu0 %v1947_v40, %s2107_s30 }
 0xccc   :  { %v1057_v1 = vpop.permute.xlu1 %1056 }
 0xccd   :  { %v2447_v3 = vadd.f32 %v1057_v1, %v1049_v62 }
 0xccf   :  { %1948 = vtanh.f32 %v2447_v3 }
 0xcdc   :  { %v1949_v5 = vpop.eup %1948 }
 0xcdd   :  { %1062 = vrot.lane.b32.xlu1 %v1949_v5, %s2107_s30 }
 0xd31   :  { %v1039_v6 = vpop.permute.xlu0 %1038 }
 0xd32   :  { %v2451_v59 = vmul.f32 %v1941_v48, %v1039_v6 }
 0xd34   :  { %v1077_v34 = vpack.c.bf16 %v2451_v59, %v2451_v59 }
 0xd36   :  { %1079 = vrot.lane.b32.xlu0 %v1077_v34, %s2115_s9 }
 0xd4f   :  { %v1063_v8 = vpop.permute.xlu1 %1062 }
 0xd50   :  { %v2456_v9 = vmul.f32 %v1945_v53, %v1063_v8 }
 0xd52   :  { %v1126_v10 = vpack.c.bf16 %v2456_v9, %v2456_v9 }
 0xd54   :  { %1128 = vrot.lane.b32.xlu1 %v1126_v10, %s2115_s9 }
 0xda8   :  { %v1080_v12 = vpop.permute.xlu0 %1079 }
 0xda9   :  { %1799 = vmatmul.mubr.msk.bf16.vlgmr.msra.gmra.mxu0 %vm121_vm1, %v1080_v12 }
 0xdaa   :  { %1811 = vmatpush3.bf16.msra.mxu0 %v2185_v4  ;;  %1814 = vmatprep.mubr.msk.bf16.mxu0 %vm2114_vm0, %v2112_v0 }
 0xdab   :  { %1812 = vmatprep.subr.bf16.mxu0 %v2112_v0 }
 0xdae   :  { %1813 = vmatpush3.bf16.msra.mxu0 %v2194_v7 }
 0xdaf   :  { %1826 = vmatprep.subr.bf16.mxu0 %v2112_v0 }
 0xdc6   :  { %v1129_v14 = vpop.permute.xlu1 %1128 }
 0xdc7   :  { %1807 = vmatmul.mubr.msk.bf16.vlgmr.msra.gmra.mxu1 %vm121_vm1, %v1129_v14 }
 0xdc8   :  { %1819 = vmatpush3.bf16.msra.mxu1 %v2204_v11  ;;  %1822 = vmatprep.mubr.msk.bf16.mxu1 %vm2114_vm0, %v2112_v0 }
 0xdc9   :  { %1820 = vmatprep.subr.bf16.mxu1 %v2112_v0 }
 0xdcc   :  { %1821 = vmatpush3.bf16.msra.mxu1 %v2211_v13 }
 0xdcd   :  { %1834 = vmatprep.subr.bf16.mxu1 %v2112_v0 }
 0xe69   :  { %v1118_v15 = vpop.f32.mrf.mxu0 }
 0xe6a   :  { %v1124_v16 = vadd.f32 %v1118_v15, %v2269_v57 }
 0xe6b   :  { %v1800_v18 = vpop.f32.mrf.mxu0 }
 0xe6c   :  { %1950 = vtanh.f32 %v1124_v16  ;;  %v1656_v33 = vmul.f32 -1.442695, %v1124_v16 }
 0xe6d   :  { %v1121_v19 = vpop.f32.mrf.mxu0 }
 0xe6f   :  { %v1801_v20 = vpop.f32.mrf.mxu0 }
 0xe79   :  { %v1951_v22 = vpop.eup %1950 }
 0xe7a   :  { %1183 = vrot.lane.b32.xlu0 %v1951_v22, %s2107_s30 }
 0xe87   :  { %v1167_v23 = vpop.f32.mrf.mxu1 }
 0xe88   :  { %v1173_v25 = vadd.f32 %v1167_v23, %v2258_v43 }
 0xe89   :  { %v1808_v26 = vpop.f32.mrf.mxu1 }
 0xe8a   :  { %1952 = vtanh.f32 %v1173_v25  ;;  %v1657_v36 = vmul.f32 -1.442695, %v1173_v25 }
 0xe8b   :  { %v1170_v28 = vpop.f32.mrf.mxu1  ;;  %1954 = vpow2.f32 %v1656_v33 }
 0xe8d   :  { %v1809_v29 = vpop.f32.mrf.mxu1 }
 0xe97   :  { %v1953_v31 = vpop.eup %1952 }
 0xe98   :  { %1207 = vrot.lane.b32.xlu1 %v1953_v31, %s2107_s30  ;;  %v1955_v57 = vpop.eup %1954 }
 0xe99   :  { %v1177_v35 = vadd.f32 1.0, %v1955_v57 }
 0xe9b   :  { %1956 = vrcp.f32 %v1177_v35 }
 0xe9c   :  { %1958 = vpow2.f32 %v1657_v36 }
 0xea8   :  { %v1957_v39 = vpop.eup %1956 }
 0xea9   :  { %v1959_v43 = vpop.eup %1958  ;;  %v1181_v50 = vmul.f32 %v1957_v39, %v2442_v55 }
 0xeaa   :  { %v1201_v52 = vadd.f32 1.0, %v1959_v43 }
 0xeac   :  { %1960 = vrcp.f32 %v1201_v52 }
 0xeb9   :  { %v1961_v45 = vpop.eup %1960 }
 0xeba   :  { %v1205_v53 = vmul.f32 %v1961_v45, %v2447_v3 }
 0xeec   :  { %v1184_v41 = vpop.permute.xlu0 %1183 }
 0xeed   :  { %v1186_v44 = vmul.f32 %v1957_v39, %v1184_v41 }
 0xeef   :  { %1188 = vrot.lane.b32.xlu0 %v1186_v44, %s2115_s9 }
 0xf0a   :  { %v1208_v47 = vpop.permute.xlu1 %1207 }
 0xf0b   :  { %v1210_v48 = vmul.f32 %v1961_v45, %v1208_v47 }
 0xf0d   :  { %1212 = vrot.lane.b32.xlu1 %v1210_v48, %s2115_s9 }
 0xf61   :  { %v1189_v51 = vpop.permute.xlu0 %1188 }
 0xf62   :  { %v2482_v49 = vadd.f32 %v1189_v51, %v1181_v50 }
 0xf64   :  { %1962 = vtanh.f32 %v2482_v49 }
 0xf71   :  { %v1963_v46 = vpop.eup %1962 }
 0xf72   :  { %1194 = vrot.lane.b32.xlu0 %v1963_v46, %s2107_s30 }
 0xf7f   :  { %v1213_v54 = vpop.permute.xlu1 %1212 }
 0xf80   :  { %v2487_v56 = vadd.f32 %v1213_v54, %v1205_v53 }
 0xf82   :  { %1964 = vtanh.f32 %v2487_v56 }
 0xf8f   :  { %v1965_v58 = vpop.eup %1964 }
 0xf90   :  { %1218 = vrot.lane.b32.xlu1 %v1965_v58, %s2107_s30 }
 0xfe4   :  { %v1195_v60 = vpop.permute.xlu0 %1194 }
 0xfe5   :  { %v2491_v55 = vmul.f32 %v1957_v39, %v1195_v60 }
 0xfe7   :  { %v1233_v40 = vpack.c.bf16 %v2491_v55, %v2491_v55 }
 0xfe9   :  { %1235 = vrot.lane.b32.xlu0 %v1233_v40, %s2115_s9 }
0x1002   :  { %v1219_v62 = vpop.permute.xlu1 %1218 }
0x1003   :  { %v2496_v1 = vmul.f32 %v1961_v45, %v1219_v62 }
0x1005   :  { %v1282_v3 = vpack.c.bf16 %v2496_v1, %v2496_v1 }
0x1007   :  { %1284 = vrot.lane.b32.xlu1 %v1282_v3, %s2115_s9 }
0x105b   :  { %v1236_v5 = vpop.permute.xlu0 %1235 }
0x105c   :  { %1815 = vmatmul.mubr.msk.bf16.vlgmr.msra.gmra.mxu0 %vm121_vm1, %v1236_v5 }
0x105d   :  { %1827 = vmatpush3.bf16.msra.mxu0 %v2185_v4  ;;  %1830 = vmatprep.mubr.msk.bf16.mxu0 %vm2114_vm0, %v2112_v0 }
0x105e   :  { %1828 = vmatprep.subr.bf16.mxu0 %v2112_v0 }
0x1061   :  { %1829 = vmatpush3.bf16.msra.mxu0 %v2194_v7 }
0x1079   :  { %v1285_v6 = vpop.permute.xlu1 %1284 }
0x107a   :  { %1823 = vmatmul.mubr.msk.bf16.vlgmr.msra.gmra.mxu1 %vm121_vm1, %v1285_v6 }
0x107b   :  { %1835 = vmatpush3.bf16.msra.mxu1 %v2204_v11  ;;  %1838 = vmatprep.mubr.msk.bf16.mxu1 %vm2114_vm0, %v2112_v0 }
0x107c   :  { %1836 = vmatprep.subr.bf16.mxu1 %v2112_v0 }
0x107f   :  { %1837 = vmatpush3.bf16.msra.mxu1 %v2211_v13 }
0x111c   :  { %v1274_v4 = vpop.f32.mrf.mxu0 }
0x111d   :  { %v1280_v34 = vadd.f32 %v1274_v4, %v2273_v61 }
0x111e   :  { %v1816_v8 = vpop.f32.mrf.mxu0 }
0x111f   :  { %1966 = vtanh.f32 %v1280_v34  ;;  %v1660_v13 = vmul.f32 -1.442695, %v1280_v34 }
0x1120   :  { %v1277_v10 = vpop.f32.mrf.mxu0 }
0x1122   :  { %v1817_v12 = vpop.f32.mrf.mxu0 }
0x112c   :  { %v1967_v7 = vpop.eup %1966 }
0x112d   :  { %1339 = vrot.lane.b32.xlu0 %v1967_v7, %s2107_s30 }
0x113a   :  { %v1323_v14 = vpop.f32.mrf.mxu1 }
0x113b   :  { %v1329_v11 = vadd.f32 %v1323_v14, %v2254_v37 }
0x113c   :  { %v1824_v15 = vpop.f32.mrf.mxu1 }
0x113d   :  { %1968 = vtanh.f32 %v1329_v11  ;;  %v1661_v20 = vmul.f32 -1.442695, %v1329_v11 }
0x113e   :  { %v1326_v16 = vpop.f32.mrf.mxu1  ;;  %1970 = vpow2.f32 %v1660_v13 }
0x1140   :  { %v1825_v18 = vpop.f32.mrf.mxu1 }
0x114a   :  { %v1969_v0 = vpop.eup %1968 }
0x114b   :  { %1363 = vrot.lane.b32.xlu1 %v1969_v0, %s2107_s30  ;;  %v1971_v61 = vpop.eup %1970 }
0x114c   :  { %v1333_v19 = vadd.f32 1.0, %v1971_v61 }
0x114e   :  { %1972 = vrcp.f32 %v1333_v19 }
0x114f   :  { %1974 = vpow2.f32 %v1661_v20 }
0x115b   :  { %v1973_v22 = vpop.eup %1972 }
0x115c   :  { %v1975_v37 = vpop.eup %1974  ;;  %v1337_v33 = vmul.f32 %v1973_v22, %v2482_v49 }
0x115d   :  { %v1357_v26 = vadd.f32 1.0, %v1975_v37 }
0x115f   :  { %1976 = vrcp.f32 %v1357_v26 }
0x116c   :  { %v1977_v28 = vpop.eup %1976 }
0x116d   :  { %v1361_v39 = vmul.f32 %v1977_v28, %v2487_v56 }
0x119f   :  { %v1340_v23 = vpop.permute.xlu0 %1339 }
0x11a0   :  { %v1342_v25 = vmul.f32 %v1973_v22, %v1340_v23 }
0x11a2   :  { %1344 = vrot.lane.b32.xlu0 %v1342_v25, %s2115_s9 }
0x11bd   :  { %v1364_v29 = vpop.permute.xlu1 %1363 }
0x11be   :  { %v1366_v31 = vmul.f32 %v1977_v28, %v1364_v29 }
0x11c0   :  { %1368 = vrot.lane.b32.xlu1 %v1366_v31, %s2115_s9 }
0x1214   :  { %v1345_v57 = vpop.permute.xlu0 %1344 }
0x1215   :  { %v1347_v35 = vadd.f32 %v1345_v57, %v1337_v33 }
0x1217   :  { %1978 = vtanh.f32 %v1347_v35 }
0x1224   :  { %v1979_v36 = vpop.eup %1978 }
0x1225   :  { %1350 = vrot.lane.b32.xlu0 %v1979_v36, %s2107_s30 }
0x1232   :  { %v1369_v41 = vpop.permute.xlu1 %1368 }
0x1233   :  { %v1371_v44 = vadd.f32 %v1369_v41, %v1361_v39 }
0x1235   :  { %1980 = vtanh.f32 %v1371_v44 }
0x1242   :  { %v1981_v43 = vpop.eup %1980 }
0x1243   :  { %1374 = vrot.lane.b32.xlu1 %v1981_v43, %s2107_s30 }
0x1297   :  { %v1351_v52 = vpop.permute.xlu0 %1350 }
0x1298   :  { %v1353_v45 = vmul.f32 %v1973_v22, %v1351_v52 }
0x129a   :  { %v1389_v47 = vpack.c.bf16 %v1353_v45, %v1353_v45 }
0x129c   :  { %1391 = vrot.lane.b32.xlu0 %v1389_v47, %s2115_s9 }
0x12b5   :  { %v1375_v48 = vpop.permute.xlu1 %1374 }
0x12b6   :  { %v2524_v50 = vmul.f32 %v1977_v28, %v1375_v48 }
0x12b8   :  { %v1438_v51 = vpack.c.bf16 %v2524_v50, %v2524_v50 }
0x12ba   :  { %1440 = vrot.lane.b32.xlu1 %v1438_v51, %s2115_s9 }
0x130e   :  { %v1392_v49 = vpop.permute.xlu0 %1391 }
0x130f   :  { %1831 = vmatmul.mubr.msk.bf16.vlgmr.msra.gmra.mxu0 %vm121_vm1, %v1392_v49 }
0x132c   :  { %v1441_v46 = vpop.permute.xlu1 %1440 }
0x132d   :  { %1839 = vmatmul.mubr.msk.bf16.vlgmr.msra.gmra.mxu1 %vm121_vm1, %v1441_v46 }
0x13cf   :  { %v1430_v53 = vpop.f32.mrf.mxu0 }
0x13d0   :  { %v1436_v54 = vadd.f32 %v1430_v53, %v2277_v2 }
0x13d1   :  { %v1832_v56 = vpop.f32.mrf.mxu0 }
0x13d2   :  { %1982 = vtanh.f32 %v1436_v54  ;;  %v1664_v8 = vmul.f32 -1.442695, %v1436_v54 }
0x13d3   :  { %v1433_v58 = vpop.f32.mrf.mxu0 }
0x13d5   :  { %v1833_v60 = vpop.f32.mrf.mxu0 }
0x13df   :  { %v1983_v40 = vpop.eup %1982 }
0x13e0   :  { %1495 = vrot.lane.b32.xlu0 %v1983_v40, %s2107_s30 }
0x13ed   :  { %v1479_v62 = vpop.f32.mrf.mxu1 }
0x13ee   :  { %v1485_v3 = vadd.f32 %v1479_v62, %v2250_v30 }
0x13ef   :  { %v1840_v5 = vpop.f32.mrf.mxu1 }
0x13f0   :  { %1984 = vtanh.f32 %v1485_v3  ;;  %v1665_v12 = vmul.f32 -1.442695, %v1485_v3 }
0x13f1   :  { %v1482_v6 = vpop.f32.mrf.mxu1  ;;  %1986 = vpow2.f32 %v1664_v8 }
0x13f3   :  { %v1841_v4 = vpop.f32.mrf.mxu1 }
0x13fd   :  { %v1985_v34 = vpop.eup %1984 }
0x13fe   :  { %1519 = vrot.lane.b32.xlu1 %v1985_v34, %s2107_s30  ;;  %v1987_v2 = vpop.eup %1986 }
0x13ff   :  { %v1489_v10 = vadd.f32 1.0, %v1987_v2 }
0x1401   :  { %1988 = vrcp.f32 %v1489_v10 }
0x1402   :  { %1990 = vpow2.f32 %v1665_v12 }
0x140e   :  { %v1989_v7 = vpop.eup %1988 }
0x140f   :  { %v1991_v30 = vpop.eup %1990  ;;  %v1493_v13 = vmul.f32 %v1989_v7, %v1347_v35 }
0x1410   :  { %v1513_v15 = vadd.f32 1.0, %v1991_v30 }
0x1412   :  { %1992 = vrcp.f32 %v1513_v15 }
0x141f   :  { %v1993_v16 = vpop.eup %1992 }
0x1420   :  { %v1517_v22 = vmul.f32 %v1993_v16, %v1371_v44 }
0x1452   :  { %v1496_v14 = vpop.permute.xlu0 %1495 }
0x1453   :  { %v1498_v11 = vmul.f32 %v1989_v7, %v1496_v14 }
0x1455   :  { %1500 = vrot.lane.b32.xlu0 %v1498_v11, %s2115_s9 }
0x1470   :  { %v1520_v18 = vpop.permute.xlu1 %1519 }
0x1471   :  { %v1522_v0 = vmul.f32 %v1993_v16, %v1520_v18 }
0x1473   :  { %1524 = vrot.lane.b32.xlu1 %v1522_v0, %s2115_s9 }
0x14c7   :  { %v1501_v61 = vpop.permute.xlu0 %1500 }
0x14c8   :  { %v1503_v19 = vadd.f32 %v1501_v61, %v1493_v13 }
0x14ca   :  { %1994 = vtanh.f32 %v1503_v19 }
0x14d7   :  { %v1995_v20 = vpop.eup %1994 }
0x14d8   :  { %1506 = vrot.lane.b32.xlu0 %v1995_v20, %s2107_s30 }
0x14dc   :  { %417 = vrot.lane.b32.xlu0 %v2291_v38, %s2115_s9 }
0x14e0   :  { %581 = vrot.lane.b32.xlu0 %v2331_v27, %s2115_s9 }
0x14e4   :  { %745 = vrot.lane.b32.xlu0 %v2371_v21, %s2115_s9 }
0x14e5   :  { %v1525_v23 = vpop.permute.xlu1 %1524 }
0x14e6   :  { %v1527_v25 = vadd.f32 %v1525_v23, %v1517_v22 }
0x14e8   :  { %1996 = vtanh.f32 %v1527_v25  ;;  %909 = vrot.lane.b32.xlu0 %v2411_v63, %s2115_s9 }
0x14ec   :  { %1067 = vrot.lane.b32.xlu0 %v2451_v59, %s2115_s9 }
0x14f0   :  { %1223 = vrot.lane.b32.xlu0 %v2491_v55, %s2115_s9 }
0x14f4   :  { %1379 = vrot.lane.b32.xlu0 %v1353_v45, %s2115_s9 }
0x14f5   :  { %v1997_v38 = vpop.eup %1996 }
0x14f6   :  { %1530 = vrot.lane.b32.xlu1 %v1997_v38, %s2107_s30 }
0x14fa   :  { %422 = vrot.lane.b32.xlu1 %v2296_v42, %s2107_s30 }
0x14fe   :  { %587 = vrot.lane.b32.xlu1 %v2336_v32, %s2107_s30 }
0x1502   :  { %751 = vrot.lane.b32.xlu1 %v2376_v24, %s2107_s30 }
0x1506   :  { %915 = vrot.lane.b32.xlu1 %v2416_v17, %s2107_s30 }
0x150a   :  { %1072 = vrot.lane.b32.xlu1 %v2456_v9, %s2107_s30 }
0x150e   :  { %1228 = vrot.lane.b32.xlu1 %v2496_v1, %s2107_s30 }
0x1512   :  { %1384 = vrot.lane.b32.xlu1 %v2524_v50, %s2107_s30 }
0x154a   :  { %v1507_v27 = vpop.permute.xlu0 %1506 }
0x154b   :  { %v1509_v42 = vmul.f32 %v1989_v7, %v1507_v27 }
0x154d   :  { %1535 = vrot.lane.b32.xlu0 %v1509_v42, %s2115_s9 }
0x154e   :  { %v418_v32 = vpop.permute.xlu0 %417 }
0x154f   :  { %420 = vst.msk [vmem:[#allocation8] sm:$0xff] %vm121_vm1, %v418_v32 }
0x1552   :  { %v582_v21 = vpop.permute.xlu0 %581 }
0x1553   :  { %585 = vst.msk [vmem:[#allocation8 + $0x8] sm:$0xff] %vm121_vm1, %v582_v21 }
0x1556   :  { %v746_v24 = vpop.permute.xlu0 %745 }
0x1557   :  { %749 = vst.msk [vmem:[#allocation8 + $0x10] sm:$0xff] %vm121_vm1, %v746_v24 }
0x155a   :  { %v910_v63 = vpop.permute.xlu0 %909 }
0x155b   :  { %913 = vst.msk [vmem:[#allocation8 + $0x18] sm:$0xff] %vm121_vm1, %v910_v63 }
0x155e   :  { %v1068_v17 = vpop.permute.xlu0 %1067 }
0x1562   :  { %v1224_v55 = vpop.permute.xlu0 %1223 }
0x1566   :  { %v1380_v26 = vpop.permute.xlu0 %1379 }
0x1568   :  { %v1531_v59 = vpop.permute.xlu1 %1530 }
0x1569   :  { %v1533_v9 = vmul.f32 %v1993_v16, %v1531_v59 }
0x156b   :  { %1540 = vrot.lane.b32.xlu0 %v1533_v9, %s2107_s30  ;;  %1545 = vrot.lane.b32.xlu1 %v1533_v9, %s2115_s9  ;;  %s1578_s30 = sshll.u32 %s2117_s3, 4  ;;  %s1579_s30 = int_to_ptr.vmem [resolvable:$true] %s1578_s30 }
0x156c   :  { %v423_v1 = vpop.permute.xlu1 %422  ;;  %s2038_s5 = scalar_lea.vmem %s1579_s30, 256  ;;  %p2043_p11 = scmp.lt.s32.totalorder %s1579_s30, %s1579_s30 }
0x156d   :  { %427 = vst.msk [vmem:[#allocation8 + $0x38] sm:$0xff] %vm426_vm2, %v423_v1  ;;  %p2039_p10 = scmp.ne.s32.totalorder %s1579_s30, %s2038_s5  ;;  %p2044_p12 = scmp.lt.s32.totalorder %s2038_s5, %s2038_s5 }
0x156f   :  { %1556 = vrot.lane.b32.xlu0 %v1527_v25, %s2116_s0  ;;  %1551 = vrot.lane.b32.xlu1 %v1503_v19, %s2116_s0  ;;  %p2045_p13 = por %p2044_p12, %p2043_p11 }
0x1570   :  { %v588_v37 = vpop.permute.xlu1 %587 }
0x1571   :  { %591 = vst.msk [vmem:[#allocation8 + $0x30] sm:$0xff] %vm426_vm2, %v588_v37  ;;  %p2046_p0 = pnand %p2045_p13, %p2039_p10 }
0x1572   :  { %1382 = vst.msk [vmem:[#allocation8 + $0x30] sm:$0xff] %vm121_vm1, %v1380_v26 }
0x1574   :  { %v752_v28 = vpop.permute.xlu1 %751 }
0x1575   :  { %755 = vst.msk [vmem:[#allocation8 + $0x28] sm:$0xff] %vm426_vm2, %v752_v28 }
0x1576   :  { %1226 = vst.msk [vmem:[#allocation8 + $0x28] sm:$0xff] %vm121_vm1, %v1224_v55 }
0x1578   :  { %v916_v29 = vpop.permute.xlu1 %915 }
0x1579   :  { %919 = vst.msk [vmem:[#allocation8 + $0x20] sm:$0xff] %vm426_vm2, %v916_v29 }
0x157a   :  { %1070 = vst.msk [vmem:[#allocation8 + $0x20] sm:$0xff] %vm121_vm1, %v1068_v17 }
0x157c   :  { %v1073_v31 = vpop.permute.xlu1 %1072 }
0x157d   :  { %1075 = vst.msk [vmem:[#allocation8 + $0x18] sm:$0xff] %vm426_vm2, %v1073_v31 }
0x1580   :  { %v1229_v33 = vpop.permute.xlu1 %1228 }
0x1581   :  { %1231 = vst.msk [vmem:[#allocation8 + $0x10] sm:$0xff] %vm426_vm2, %v1229_v33 }
0x1584   :  { %v1385_v57 = vpop.permute.xlu1 %1384 }
0x1585   :  { %1387 = vst.msk [vmem:[#allocation8 + $0x8] sm:$0xff] %vm426_vm2, %v1385_v57 }
0x15bf   :  { %v1536_v35 = vpop.permute.xlu0 %1535 }
0x15c0   :  { %1538 = vst.msk [vmem:[#allocation8 + $0x38] sm:$0xff] %vm121_vm1, %v1536_v35  ;;  %1544 = vst.msk [vmem:[#allocation9] sm:$0xff] %vm121_vm1, %v1536_v35 }
0x15dd   :  { %v1541_v36 = vpop.permute.xlu0 %1540  ;;  %v1546_v39 = vpop.permute.xlu1 %1545 }
0x15de   :  { %1543 = vst.msk [vmem:[#allocation8] sm:$0xff] %vm426_vm2, %v1541_v36 }
0x15df   :  { %1549 = vst.msk [vmem:[#allocation9 + $0x8] sm:$0xff] %vm121_vm1, %v1546_v39 }
0x15e0   :  { %2049 = shalt.err (!%p2046_p0)
}
0x15e1   :  { %1584 = dma.vmem_to_hbm [thread:$0]  %s1579_s30, 256, %s2621_s7, [#allocation10], %s2110_s15, %s2110_s15, %s2111_s16  }
0x15e2   :  { %s2058_s24 = scalar_lea.vmem %s1567_s19, 1024  ;;  %p2063_p2 = scmp.lt.s32.totalorder %s1567_s19, %s1567_s19 }
0x15e3   :  { %p2059_p1 = scmp.ne.s32.totalorder %s1567_s19, %s2058_s24  ;;  %p2064_p3 = scmp.lt.s32.totalorder %s2058_s24, %s2058_s24 }
0x15e5   :  { %p2065_p4 = por %p2064_p3, %p2063_p2 }
0x15e7   :  { %p2066_p5 = pnand %p2065_p4, %p2059_p1 }
0x15e9   :  { %2069 = shalt.err (!%p2066_p5)
}
0x15ea   :  { %1572 = dma.vmem_to_hbm [thread:$0]  %s1567_s19, 1024, %s2620_s6, [#allocation5], %s2110_s15, %s2110_s15, %s2111_s16   ;;  %v1557_v41 = vpop.permute.xlu0 %1556  ;;  %v1552_v44 = vpop.permute.xlu1 %1551 }
0x15eb   :  { %1560 = vst.msk [vmem:[#allocation11 + $0x8] sm:$0xff] %vm121_vm1, %v1557_v41  ;;  %1554 = vst.msk [vmem:[#allocation11] sm:$0xff] %vm121_vm1, %v1552_v44  ;;  %s2078_s7 = scalar_lea.vmem %s2587_s21, 256  ;;  %p2083_p7 = scmp.lt.s32.totalorder %s2587_s21, %s2587_s21 }
0x15ec   :  { %p2079_p6 = scmp.ne.s32.totalorder %s2587_s21, %s2078_s7  ;;  %p2084_p8 = scmp.lt.s32.totalorder %s2078_s7, %s2078_s7 }
0x15ee   :  { %p2085_p9 = por %p2084_p8, %p2083_p7 }
0x15f0   :  { %p2086_p10 = pnand %p2085_p9, %p2079_p6 }
0x15f2   :  { %2089 = shalt.err (!%p2086_p10)
}
0x15f3   :  { %1596 = dma.vmem_to_hbm [thread:$0]  %s2587_s21, 256, %s2622_s8, [#allocation10], %s2110_s15, %s2110_s15, %s2111_s16  }
0x15f4   :  { %2102 = dma.done.wait [#allocation5], 1024  }
0x15f5   :  { %2103 = vsyncadd [#allocation5], 4294966272 }
0x15f6   :  { %2104 = dma.done.wait [#allocation10], 512  }
0x15f7   :  { %2105 = vsyncadd [#allocation10], 4294966784 }
0x15f8   :  { %1606 = vsyncpa [#allocation4], 1 }
0x15f9   :  { %1607 = vsyncpa [#allocation7], 1 }
0x15fa   :  { %1608 = vsyncpa [#allocation5], 1 }
0x15fb   :  { %1609 = vsyncpa [#allocation10], 1 }

</bundles_post_ra>
